<compile_context>
chip_gen: v7x
topology: tpu7x:2x2x1
jax: 0.10.0
libtpu: 0.0.40
codegen_flags: <defaults>
</compile_context>

<pallas_src>
import jax
import jax.numpy as jnp
import numpy as np
from jax.experimental import pallas as pl
from jax.experimental.pallas import tpu as pltpu


def _bilinear_matrix(out_size, in_size):
    """Matrix form of torch F.interpolate(mode='bilinear', align_corners=False) along one axis."""
    i = jnp.arange(out_size, dtype=jnp.float32)
    scale = in_size / out_size
    src = (i + 0.5) * scale - 0.5
    src = jnp.clip(src, 0.0, float(in_size - 1))
    i0 = jnp.clip(jnp.floor(src).astype(jnp.int32), 0, in_size - 1)
    i1 = jnp.minimum(i0 + 1, in_size - 1)
    frac = src - i0.astype(jnp.float32)
    m = jnp.zeros((out_size, in_size), jnp.float32)
    rows = jnp.arange(out_size)
    m = m.at[rows, i0].add(1.0 - frac)
    m = m.at[rows, i1].add(frac)
    return m


def _apply_activation(o, name):
    """Activation module semantics, applied on a channels-first (Cout, H*W) tile."""
    if name is None or name == "identity":
        return o
    if name == "sigmoid":
        return 1.0 / (1.0 + jnp.exp(-o))
    if name in ("softmax", "softmax2d"):
        # nn.Softmax(dim=1) on NCHW == softmax over the channel axis (axis 0 here)
        m = jnp.max(o, axis=0, keepdims=True)
        e = jnp.exp(o - m)
        return e / jnp.sum(e, axis=0, keepdims=True)
    if name == "logsoftmax":
        m = jnp.max(o, axis=0, keepdims=True)
        s = jnp.sum(jnp.exp(o - m), axis=0, keepdims=True)
        return o - m - jnp.log(s)
    # TODO(synk): 'argmax'/'argmax2d' (integer outputs) and arbitrary callables
    # are not lowered in-kernel.
    raise ValueError(f"unsupported activation: {name!r}")


def custom_segmentation_head(x_nchw, target_hw, weight_oihw, bias, activation=None):
    """Conv2d(K, padding=K//2) -> bilinear resize to target_hw -> Activation(name).

    x_nchw: (B, Cin, H, W) float32, returns (B, Cout, Hout, Wout) float32.
    """
    B, Cin, H, W = x_nchw.shape
    Cout, _, K, _ = weight_oihw.shape
    Hout, Wout = int(target_hw[0]), int(target_hw[1])
    pad = K // 2
    HW, HWout = H * W, Hout * Wout

    # Conv weight flattened with tap order (kh, kw, ci) to match the in-kernel im2col.
    w_flat = jnp.transpose(weight_oihw, (0, 2, 3, 1)).reshape(Cout, K * K * Cin)
    b_col = bias.reshape(Cout, 1)

    # Separable bilinear resize fused into a single (H*W, Hout*Wout) matrix.
    # Each column has only 4 non-zeros, so this is numerically equivalent to the
    # two separable matmuls but needs no in-kernel transposes/reshapes.
    wh = _bilinear_matrix(Hout, H)          # (Hout, H)
    ww = _bilinear_matrix(Wout, W)          # (Wout, W)
    r = jnp.kron(wh, ww).T                  # (H*W, Hout*Wout)

    def kernel(x_ref, w_ref, b_ref, r_ref, out_ref, xpad):
        # x_ref:  (1, Cin, H, W)        raw NCHW features, one batch element
        # w_ref:  (Cout, K*K*Cin)       flattened conv weight
        # b_ref:  (Cout, 1)             conv bias
        # r_ref:  (H*W, Hout*Wout)      fused bilinear-resize matrix
        # out_ref:(1, Cout, Hout*Wout)  lane-dense NCHW output (flattened spatial)
        # xpad:   VMEM scratch (Cin, H+2p, W+2p) zero-padded staging buffer

        # Fold the "same" zero padding into the kernel (no wrapper pad/transpose pass).
        xpad[...] = jnp.zeros_like(xpad)
        xpad[:, pad:pad + H, pad:pad + W] = x_ref[0]

        # im2col: one (K*K*Cin, H*W) patch matrix, tap order (kh, kw, ci).
        taps = [xpad[:, kh:kh + H, kw:kw + W]
                for kh in range(K) for kw in range(K)]          # each (Cin, H, W)
        patch = jnp.concatenate(taps, axis=0).reshape(K * K * Cin, HW)

        # Single conv matmul (channels-first, lane axis = H*W) + bias.
        y = jnp.dot(w_ref[...], patch,
                    preferred_element_type=jnp.float32) + b_ref[...]   # (Cout, H*W)

        # Fused bilinear resize: one lane-dense matmul, no transposes.
        o = jnp.dot(y, r_ref[...],
                    preferred_element_type=jnp.float32)                # (Cout, Hout*Wout)

        out_ref[0] = _apply_activation(o, activation).astype(out_ref.dtype)

    out_flat = pl.pallas_call(
        kernel,
        out_shape=jax.ShapeDtypeStruct((B, Cout, HWout), jnp.float32),
        grid=(B,),
        in_specs=[
            pl.BlockSpec((1, Cin, H, W), lambda b: (b, 0, 0, 0)),
            pl.BlockSpec((Cout, K * K * Cin), lambda b: (0, 0)),
            pl.BlockSpec((Cout, 1), lambda b: (0, 0)),
            pl.BlockSpec((HW, HWout), lambda b: (0, 0)),
        ],
        out_specs=pl.BlockSpec((1, Cout, HWout), lambda b: (b, 0, 0)),
        scratch_shapes=[pltpu.VMEM((Cin, H + 2 * pad, W + 2 * pad), jnp.float32)],
        compiler_params=pltpu.CompilerParams(
            dimension_semantics=("parallel",)),
    )(x_nchw, w_flat, b_col, r)

    # Pure metadata reshape (contiguous flatten of the last two dims) -> NCHW.
    return out_flat.reshape(B, Cout, Hout, Wout)


def _reference(x_nchw, target_hw, weight_oihw, bias):
    """Plain-JAX reference (conv + separable bilinear) for a correctness check."""
    K = weight_oihw.shape[2]
    pad = K // 2
    y = jax.lax.conv_general_dilated(
        x_nchw, weight_oihw, window_strides=(1, 1),
        padding=((pad, pad), (pad, pad)),
        dimension_numbers=("NCHW", "OIHW", "NCHW"))
    y = y + bias[None, :, None, None]
    Hout, Wout = int(target_hw[0]), int(target_hw[1])
    wh = _bilinear_matrix(Hout, y.shape[2])
    ww = _bilinear_matrix(Wout, y.shape[3])
    return jnp.einsum("ph,nchw,qw->ncpq", wh, y, ww)


if __name__ == "__main__":
    key = jax.random.PRNGKey(0)
    k1, k2, k3, k4 = jax.random.split(key, 4)

    B, Cin, H, W = 2, 4, 16, 16
    Cout, K = 3, 3
    Hout, Wout = 32, 32

    decoder_input = jax.random.normal(k1, (B, Cin, H, W), dtype=jnp.float32)
    # `input` in the torch forward is only used for its spatial size (shape[2:])
    full_res_input = jax.random.normal(k2, (B, Cout, Hout, Wout), dtype=jnp.float32)

    # Deterministic Conv2d parameter init (uniform +/- 1/sqrt(fan_in), like torch default)
    fan_in = Cin * K * K
    bound = 1.0 / np.sqrt(fan_in)
    weight = jax.random.uniform(k3, (Cout, Cin, K, K), jnp.float32, -bound, bound)
    bias = jax.random.uniform(k4, (Cout,), jnp.float32, -bound, bound)

    target_hw = full_res_input.shape[2:]
    ref = _reference(decoder_input, target_hw, weight, bias)

    # Activation(None) == nn.Identity (the CustomUnet default)
    out = custom_segmentation_head(decoder_input, target_hw, weight, bias, activation=None)
    out = jax.block_until_ready(out)
    assert out.shape == (B, Cout, Hout, Wout)
    np.testing.assert_allclose(np.asarray(out), np.asarray(ref), rtol=1e-5, atol=1e-5)

    # Activation('sigmoid')
    out_sig = jax.block_until_ready(
        custom_segmentation_head(decoder_input, target_hw, weight, bias, activation="sigmoid"))
    np.testing.assert_allclose(np.asarray(out_sig), np.asarray(jax.nn.sigmoid(ref)),
                               rtol=1e-5, atol=1e-5)

    # Activation('softmax2d') == nn.Softmax(dim=1) over channels
    out_sm = jax.block_until_ready(
        custom_segmentation_head(decoder_input, target_hw, weight, bias, activation="softmax2d"))
    np.testing.assert_allclose(np.asarray(out_sm), np.asarray(jax.nn.softmax(ref, axis=1)),
                               rtol=1e-5, atol=1e-5)

    print("KERNEL_OK")
</pallas_src>

<mosaic_0001>
module attributes {stable_mosaic.version = 11 : i64} {
  func.func @kernel(%arg0: i32, %arg1: memref<1x4x16x16xf32, #tpu.memory_space<vmem>>, %arg2: memref<3x36xf32, #tpu.memory_space<vmem>>, %arg3: memref<3x1xf32, #tpu.memory_space<vmem>>, %arg4: memref<256x1024xf32, #tpu.memory_space<vmem>>, %arg5: memref<1x3x1024xf32, #tpu.memory_space<vmem>>, %arg6: memref<4x18x18xf32, #tpu.memory_space<vmem>>) attributes {dimension_semantics = [#tpu.dimension_semantics<parallel>], iteration_bounds = array<i64: 2>, scalar_prefetch = 0 : i64, scratch_operands = 1 : i64, tpu.core_type = #tpu.core_type<tc>, window_params = [{transform_indices = @transform_0, window_bounds = array<i64: 1, 4, 16, 16>}, {pipeline_mode = #tpu.pipeline_mode<synchronous>, transform_indices = @transform_1, window_bounds = array<i64: 3, 36>}, {pipeline_mode = #tpu.pipeline_mode<synchronous>, transform_indices = @transform_2, window_bounds = array<i64: 3, 1>}, {pipeline_mode = #tpu.pipeline_mode<synchronous>, transform_indices = @transform_3, window_bounds = array<i64: 256, 1024>}, {transform_indices = @transform_4, window_bounds = array<i64: 1, 3, 1024>}]} {
    %cst = arith.constant 0.000000e+00 : f32
    %0 = vector.broadcast %cst : f32 to vector<4x18x18xf32>
    %c0 = arith.constant 0 : index
    %c0_0 = arith.constant 0 : index
    %c0_1 = arith.constant 0 : index
    %1 = vector.load %arg6[%c0, %c0_0, %c0_1] : memref<4x18x18xf32, #tpu.memory_space<vmem>>, vector<4x18x18xf32>
    tpu.vector_store %arg6[%c0, %c0_0, %c0_1], %0 {strides = array<i32>} : memref<4x18x18xf32, #tpu.memory_space<vmem>>, vector<4x18x18xf32>,
    %c0_2 = arith.constant 0 : index
    %c0_3 = arith.constant 0 : index
    %c0_4 = arith.constant 0 : index
    %c0_5 = arith.constant 0 : index
    %2 = vector.load %arg1[%c0_2, %c0_3, %c0_4, %c0_5] : memref<1x4x16x16xf32, #tpu.memory_space<vmem>>, vector<1x4x16x16xf32>
    %3 = vector.shape_cast %2 : vector<1x4x16x16xf32> to vector<4x16x16xf32>
    %c0_6 = arith.constant 0 : index
    %c1 = arith.constant 1 : index
    %c1_7 = arith.constant 1 : index
    %4 = vector.load %arg6[%c0_6, %c1, %c1_7] : memref<4x18x18xf32, #tpu.memory_space<vmem>>, vector<4x16x16xf32>
    tpu.vector_store %arg6[%c0_6, %c1, %c1_7], %3 {strides = array<i32>} : memref<4x18x18xf32, #tpu.memory_space<vmem>>, vector<4x16x16xf32>,
    %c0_8 = arith.constant 0 : index
    %c0_9 = arith.constant 0 : index
    %c0_10 = arith.constant 0 : index
    %5 = vector.load %arg6[%c0_8, %c0_9, %c0_10] : memref<4x18x18xf32, #tpu.memory_space<vmem>>, vector<4x16x16xf32>
    %c0_11 = arith.constant 0 : index
    %c0_12 = arith.constant 0 : index
    %c1_13 = arith.constant 1 : index
    %6 = vector.load %arg6[%c0_11, %c0_12, %c1_13] : memref<4x18x18xf32, #tpu.memory_space<vmem>>, vector<4x16x16xf32>
    %c0_14 = arith.constant 0 : index
    %c0_15 = arith.constant 0 : index
    %c2 = arith.constant 2 : index
    %7 = vector.load %arg6[%c0_14, %c0_15, %c2] : memref<4x18x18xf32, #tpu.memory_space<vmem>>, vector<4x16x16xf32>
    %c0_16 = arith.constant 0 : index
    %c1_17 = arith.constant 1 : index
    %c0_18 = arith.constant 0 : index
    %8 = vector.load %arg6[%c0_16, %c1_17, %c0_18] : memref<4x18x18xf32, #tpu.memory_space<vmem>>, vector<4x16x16xf32>
    %c0_19 = arith.constant 0 : index
    %c1_20 = arith.constant 1 : index
    %c1_21 = arith.constant 1 : index
    %9 = vector.load %arg6[%c0_19, %c1_20, %c1_21] : memref<4x18x18xf32, #tpu.memory_space<vmem>>, vector<4x16x16xf32>
    %c0_22 = arith.constant 0 : index
    %c1_23 = arith.constant 1 : index
    %c2_24 = arith.constant 2 : index
    %10 = vector.load %arg6[%c0_22, %c1_23, %c2_24] : memref<4x18x18xf32, #tpu.memory_space<vmem>>, vector<4x16x16xf32>
    %c0_25 = arith.constant 0 : index
    %c2_26 = arith.constant 2 : index
    %c0_27 = arith.constant 0 : index
    %11 = vector.load %arg6[%c0_25, %c2_26, %c0_27] : memref<4x18x18xf32, #tpu.memory_space<vmem>>, vector<4x16x16xf32>
    %c0_28 = arith.constant 0 : index
    %c2_29 = arith.constant 2 : index
    %c1_30 = arith.constant 1 : index
    %12 = vector.load %arg6[%c0_28, %c2_29, %c1_30] : memref<4x18x18xf32, #tpu.memory_space<vmem>>, vector<4x16x16xf32>
    %c0_31 = arith.constant 0 : index
    %c2_32 = arith.constant 2 : index
    %c2_33 = arith.constant 2 : index
    %13 = vector.load %arg6[%c0_31, %c2_32, %c2_33] : memref<4x18x18xf32, #tpu.memory_space<vmem>>, vector<4x16x16xf32>
    %14 = tpu.concatenate %5, %6, %7, %8, %9, %10, %11, %12, %13 in 0 : vector<4x16x16xf32>, vector<4x16x16xf32>, vector<4x16x16xf32>, vector<4x16x16xf32>, vector<4x16x16xf32>, vector<4x16x16xf32>, vector<4x16x16xf32>, vector<4x16x16xf32>, vector<4x16x16xf32> -> vector<36x16x16xf32>
    %15 = vector.shape_cast %14 : vector<36x16x16xf32> to vector<36x256xf32>
    %c0_34 = arith.constant 0 : index
    %c0_35 = arith.constant 0 : index
    %16 = vector.load %arg2[%c0_34, %c0_35] : memref<3x36xf32, #tpu.memory_space<vmem>>, vector<3x36xf32>
    %cst_36 = arith.constant dense<0.000000e+00> : vector<3x256xf32>
    %17 = tpu.matmul %16, %15, %cst_36 {dimension_numbers = #tpu.dot_dimension_numbers<[1], [0], [0], [1], [0, 0, 1, 1], [], []>} : vector<3x36xf32>, vector<36x256xf32>, vector<3x256xf32> -> vector<3x256xf32>
    %c0_37 = arith.constant 0 : index
    %c0_38 = arith.constant 0 : index
    %18 = vector.load %arg3[%c0_37, %c0_38] : memref<3x1xf32, #tpu.memory_space<vmem>>, vector<3x1xf32>
    %19 = vector.broadcast %18 : vector<3x1xf32> to vector<3x256xf32>
    %20 = arith.addf %17, %19 : vector<3x256xf32>
    %c0_39 = arith.constant 0 : index
    %c0_40 = arith.constant 0 : index
    %21 = vector.load %arg4[%c0_39, %c0_40] : memref<256x1024xf32, #tpu.memory_space<vmem>>, vector<256x1024xf32>
    %cst_41 = arith.constant dense<0.000000e+00> : vector<3x1024xf32>
    %22 = tpu.matmul %20, %21, %cst_41 {dimension_numbers = #tpu.dot_dimension_numbers<[1], [0], [0], [1], [0, 0, 1, 1], [], []>} : vector<3x256xf32>, vector<256x1024xf32>, vector<3x1024xf32> -> vector<3x1024xf32>
    %c0_42 = arith.constant 0 : index
    %c0_43 = arith.constant 0 : index
    %c0_44 = arith.constant 0 : index
    %23 = vector.load %arg5[%c0_42, %c0_43, %c0_44] : memref<1x3x1024xf32, #tpu.memory_space<vmem>>, vector<1x3x1024xf32>
    %24 = vector.shape_cast %23 : vector<1x3x1024xf32> to vector<3x1024xf32>
    %25 = vector.shape_cast %22 : vector<3x1024xf32> to vector<1x3x1024xf32>
    tpu.vector_store %arg5[%c0_42, %c0_43, %c0_44], %25 {strides = array<i32>} : memref<1x3x1024xf32, #tpu.memory_space<vmem>>, vector<1x3x1024xf32>,
    return
  }
  func.func @transform_0(%arg0: i32) -> (i32, i32, i32, i32) {
    %c0_i32 = arith.constant 0 : i32
    %c0_i32_0 = arith.constant 0 : i32
    %c0_i32_1 = arith.constant 0 : i32
    %c0_i32_2 = arith.constant 0 : i32
    return %arg0, %c0_i32, %c0_i32_0, %c0_i32_1 : i32, i32, i32, i32
  }
  func.func @transform_1(%arg0: i32) -> (i32, i32) {
    %c0_i32 = arith.constant 0 : i32
    %c0_i32_0 = arith.constant 0 : i32
    %c0_i32_1 = arith.constant 0 : i32
    return %c0_i32, %c0_i32_0 : i32, i32
  }
  func.func @transform_2(%arg0: i32) -> (i32, i32) {
    %c0_i32 = arith.constant 0 : i32
    %c0_i32_0 = arith.constant 0 : i32
    %c0_i32_1 = arith.constant 0 : i32
    return %c0_i32, %c0_i32_0 : i32, i32
  }
  func.func @transform_3(%arg0: i32) -> (i32, i32) {
    %c0_i32 = arith.constant 0 : i32
    %c0_i32_0 = arith.constant 0 : i32
    %c0_i32_1 = arith.constant 0 : i32
    return %c0_i32, %c0_i32_0 : i32, i32
  }
  func.func @transform_4(%arg0: i32) -> (i32, i32, i32) {
    %c0_i32 = arith.constant 0 : i32
    %c0_i32_0 = arith.constant 0 : i32
    %c0_i32_1 = arith.constant 0 : i32
    return %arg0, %c0_i32, %c0_i32_0 : i32, i32, i32
  }
}

</mosaic_0001>

<bundles_post_ra>
// kernel: tpu_custom_call.1
= control target key start
LH: loop header
LB: loop body
LE: loop exit
PB: predicated region body
PF: predicated region fallthrough
CT: control target
= control target key end

     0   :  { %9 = vsyncpa [#allocation4], 0  ;;  %s4538_s0 = inlined_call_operand.hbm [shape: f32[2,4,16,16], index: 0, kind: input, shape index: {}]   ;;  %s4539_s1 = inlined_call_operand.vmem [shape: f32[3,36], index: 1, kind: input, shape index: {}]   ;;  %s4540_s2 = inlined_call_operand.vmem [shape: f32[3,1], index: 2, kind: input, shape index: {}]   ;;  %s4541_s3 = inlined_call_operand.hbm [shape: f32[256,1024], index: 3, kind: input, shape index: {}]   ;;  %s4542_s4 = inlined_call_operand.vmem [shape: f32[2,3,1024], index: 4, kind: output, shape index: {}]  }
   0x1   :  { %11 = vsyncpa [#allocation4 + $0x1], 0 }
   0x2   :  { %12 = vsyncpa [#allocation6], 0  ;;  %s3454_s15 = smov 0   ;;  %s3456_s16 = smov 0  }
   0x3   :  { %s3458_s17 = smov 0   ;;  %s3460_s18 = smov 0  }
   0x4 LB: > { %s3473_s19 = sadd.s32 4294967295, %s3407_s18   ;;  %p38_p0 = scmp.ne.s32.totalorder %s3399_s16, %s3395_s15  ;;  %s3407_s18 = sphi %s3460_s18, %s4605_s18   ;;  %s3403_s17 = sphi %s3458_s17, %s4604_s17   ;;  %s3399_s16 = sphi %s3456_s16, %s4603_s16   ;;  %s3395_s15 = sphi %s3454_s15, %s4602_s15  }
   0x5   : > { %p4543_p1 = scmp.eq.s32.totalorder %s3473_s19, 0  ;;  %p2796_p2 = scmp.ge.s32.totalorder %s3407_s18, 1 }
   0x6   : > { %p138_p3 = scmp.lt.s32.totalorder %s3407_s18, 3  ;;  %s3409_s22 = smov [#allocation5]  }
   0x7   : > { %p3481_p4 = por %p4543_p1, %p38_p0  ;;  %s156_s23 = sshll.u32 %s3409_s22, 4  ;;  %s157_s23 = int_to_ptr.vmem [resolvable:$true] %s156_s23 }
   0x8   : > { %p3485_p5 = pnand %p2796_p2, %p138_p3  ;;  %s3498_s25 = sadd.s32 1, %s3407_s18  }
   0x9   : > { %s4556_s20 = scalar_select %p3481_p4, 1, 0 }
   0xa   : > { %s4557_s21 = scalar_select %p3485_p5, 1, 0 }
   0xb   : > { %p3084_p6 = pneg %p3485_p5  ;;  %s25_s26 = sadd.s32 1, %s3403_s17 }
   0xc   : > { %s22_s27 = ssub.s32 %s3407_s18, %s3498_s25  ;;  %s3311_s30 = scalar_lea.hbm %s4541_s3, 32768 }
   0xd   : > { %p3493_p7 = pnand %p3084_p6, %p4543_p1  ;;  %p3312_p8 = scmp.ne.s32.totalorder %s4541_s3, %s3311_s30 }
   0xe   : > { %p3318_p12 = scmp.lt.u32.totalorder %s3311_s30, %s4541_s3 }
   0xf   : > { %p3313_p9 = pneg %p3493_p7 }
  0x11   : > { %p3314_p10 = pnand %p3313_p9, %p3312_p8 }
  0x13   : > { %p3315_p11 = pneg %p3314_p10 }
  0x15   : > { %p3320_p13 = pnand %p3318_p12, %p3315_p11 }
  0x17   : > { %3323 = shalt.err (!%p3320_p13)
}
  0x18   : > { %s3324_s9 = scalar_lea.vmem %s157_s23, 32768  ;;  %p3332_p6 = scmp.lt.s32.totalorder %s157_s23, %s157_s23 }
  0x19   : > { %p3325_p0 = scmp.ne.s32.totalorder %s157_s23, %s3324_s9  ;;  %p3333_p1 = scmp.lt.s32.totalorder %s3324_s9, %s3324_s9 }
  0x1b   : > { %p3327_p2 = pnand %p3325_p0, %p3313_p9  ;;  %p3334_p4 = por %p3333_p1, %p3332_p6 }
  0x1d   : > { %p3328_p3 = pneg %p3327_p2 }
  0x1f   : > { %p3335_p5 = pnand %p3334_p4, %p3328_p3 }
  0x21   : > { %3338 = shalt.err (!%p3335_p5)
}
  0x22   : > { %s3410_s10 = smov 1024   ;;  %s3411_s11 = smov 64  }
  0x23   : > { %3087 = dma.hbm_to_vmem [thread:$0]  (!%p3493_p7), %s4541_s3, 32768, %s157_s23, [#allocation6], %s3410_s10, %s3410_s10, %s3411_s11  }
  0x24   : > { %p23_p8 = scmp.eq.s32.totalorder %s22_s27, 0  ;;  %p32_p9 = scmp.ne.s32.totalorder %s3403_s17, %s3399_s16 }
  0x25   : > { %p33_p1 = scmp.eq.s32.totalorder %s3407_s18, 0  ;;  %p3093_p4 = scmp.lt.s32.totalorder %s3407_s18, 2 }
  0x26   : > { %s3524_s14 = scalar_select %p23_p8, %s3403_s17, %s25_s26  }
  0x27   : > { %p34_p5 = por %p33_p1, %p32_p9  ;;  %s170_s15 = sand.u32 1, %s3403_s17  }
  0x28   : > { %s2799_s22 = sshll.u32 %s170_s15, 6  ;;  %s2812_s28 = sshll.u32 %s3407_s18, 10 }
  0x29   : > { %s3531_s5 = scalar_lea.hbm %s4538_s0, %s2812_s28  ;;  %s174_s23 = scalar_lea.vmem [#allocation3], %s2799_s22 }
  0x2a   : > { %s181_s24 = sshll.u32 %s174_s23, 4  ;;  %p3535_p7 = pnand %p3093_p4, %p34_p5  ;;  %s3533_s24 = int_to_ptr.vmem [resolvable:$true] %s181_s24 }
  0x2b   : > { %s3539_s18 = scalar_lea.sflag [#allocation4], %s170_s15  ;;  %s3339_s27 = scalar_lea.hbm %s3531_s5, 1024 }
  0x2c   : > { %p3340_p10 = scmp.ne.s32.totalorder %s3531_s5, %s3339_s27  ;;  %p3341_p11 = pneg %p3535_p7 }
  0x2d   : > { %s3344_s8 = scalar_lea.hbm %s4538_s0, 2048  ;;  %p3345_p0 = scmp.lt.u32.totalorder %s3531_s5, %s4538_s0 }
  0x2e   : > { %p3342_p12 = pnand %p3341_p11, %p3340_p10  ;;  %p3346_p2 = scmp.lt.u32.totalorder %s3344_s8, %s3339_s27 }
  0x2f   : > { %p3348_p6 = scmp.lt.u32.totalorder %s3339_s27, %s3531_s5 }
  0x30   : > { %p3343_p13 = pneg %p3342_p12  ;;  %p3347_p3 = por %p3346_p2, %p3345_p0 }
  0x32   : > { %p3349_p8 = por %p3348_p6, %p3347_p3 }
  0x34   : > { %p3350_p9 = pnand %p3349_p8, %p3343_p13 }
  0x36   : > { %3353 = shalt.err (!%p3350_p9)
}
  0x37   : > { %s3354_s11 = scalar_lea.vmem %s3533_s24, 1024  ;;  %s3412_s12 = smov [#allocation3]  }
  0x38   : > { %p3355_p1 = scmp.ne.s32.totalorder %s3533_s24, %s3354_s11  ;;  %s3359_s13 = sshll.u32 %s3412_s12, 4  ;;  %s3360_s13 = int_to_ptr.vmem [resolvable:$false] %s3359_s13 }
  0x39   : > { %s3361_s15 = scalar_lea.vmem %s3360_s13, 2048  ;;  %p3362_p10 = scmp.lt.s32.totalorder %s3533_s24, %s3360_s13 }
  0x3a   : > { %p3357_p4 = pnand %p3355_p1, %p3341_p11  ;;  %p3363_p12 = scmp.lt.s32.totalorder %s3361_s15, %s3354_s11 }
  0x3c   : > { %p3358_p5 = pneg %p3357_p4  ;;  %p3364_p0 = por %p3363_p12, %p3362_p10 }
  0x3e   : > { %p3365_p2 = pnand %p3364_p0, %p3358_p5 }
  0x40   : > { %3368 = shalt.err (!%p3365_p2)
}
  0x41   : > { %s3413_s22 = smov 128   ;;  %s3414_s28 = smov 8  }
  0x42   : > { %3091 = dma.hbm_to_vmem [thread:$0]  (!%p3535_p7), %s3531_s5, 1024, %s3533_s24, %s3539_s18, %s3413_s22, %s3413_s22, %s3414_s28  }
  0x43   : > { %p4560_p11 = scmp.ne.s32.totalorder %s4557_s21, 0 }
  0x45   : > { %193 = sbr.rel (%p4560_p11) target bundleno = 1124 (0x464), region = 36 }
  0x4c   : > { %s195_s29 = sand.u32 1, %s3399_s16   ;;  %p4561_p13 = scmp.ne.s32.totalorder %s4556_s20, 0 }
  0x4d   : > { %s2803_s30 = sshll.u32 %s195_s29, 6  ;;  %s196_s23 = scalar_lea.sflag [#allocation4], %s195_s29 }
  0x4e   : > { %s3570_s27 = scalar_lea.vmem [#allocation3], %s2803_s30 }
  0x4f   : > { %3386 = dma.done.wait (%p4561_p13), %s196_s23, 1024  }
  0x50   : > { %3388 = vsyncadd (%p4561_p13), %s196_s23, 4294966272  ;;  %p4562_p3 = scmp.eq.s32.totalorder %s3473_s19, 0 }
  0x52   : > { %3390 = dma.done.wait (%p4562_p3), [#allocation6], 32768   ;;  %p4563_p7 = pmov %p4562_p3 }
  0x53   : > { %vm233_vm0 = vcmask 146432   ;;  %v4546_v0 = vmov 0.0   ;;  %vm236_vm1 = vcmask 140288   ;;  %v249_v1 = vld [vmem:[%s3570_s27 + $0x10] sm:$0xff]  ;;  %v247_v2 = vld [vmem:[%s3570_s27] sm:$0xff]  ;;  %s3416_s20 = smov 1   ;;  %v493_v21 = vlaneseq }
  0x54   : > { %3392 = vsyncadd (%p4563_p7), [#allocation6], 4294934528  ;;  %238 = vst.msk [vmem:[#allocation2 + $0x18] sm:$0xff] %vm233_vm0, %v4546_v0  ;;  %2151 = vmatprep.mubr.f32.mxu0 %v4546_v0  ;;  %267 = vrot.lane.b32.xlu1 %v249_v1, %s3416_s20  ;;  %v250_v3 = vld [vmem:[%s3570_s27 + $0x18] sm:$0xff]  ;;  %v248_v4 = vld [vmem:[%s3570_s27 + $0x8] sm:$0xff]  ;;  %vm287_vm2 = vcmask 138248  }
  0x55   : > { %239 = vst.msk [vmem:[#allocation2 + $0x20] sm:$0xff] %vm233_vm0, %v4546_v0  ;;  %234 = vst.msk [vmem:[#allocation2] sm:$0xff] %vm233_vm0, %v4546_v0  ;;  %263 = vrot.lane.b32.xlu0 %v247_v2, %s3416_s20  ;;  %v252_v5 = vld [vmem:[%s3570_s27 + $0x28] sm:$0xff]  ;;  %v251_v6 = vld [vmem:[%s3570_s27 + $0x20] sm:$0xff]  ;;  %s3417_s21 = smov 127   ;;  %v3628_v34 = vshrl.u32 %v493_v21, 7 }
  0x56   : > { %235 = vst.msk [vmem:[#allocation2 + $0x8] sm:$0xff] %vm233_vm0, %v4546_v0  ;;  %241 = vst.msk [vmem:[#allocation2 + $0x30] sm:$0xff] %vm233_vm0, %v4546_v0  ;;  %v254_v7 = vld [vmem:[%s3570_s27 + $0x38] sm:$0xff]  ;;  %v253_v8 = vld [vmem:[%s3570_s27 + $0x30] sm:$0xff]  ;;  %v3418_v19 = vmov 1983009808  }
  0x57   : > { %242 = vst.msk [vmem:[#allocation2 + $0x38] sm:$0xff] %vm233_vm0, %v4546_v0  ;;  %244 = vst.msk [vmem:[#allocation2 + $0x48] sm:$0xff] %vm233_vm0, %v4546_v0  ;;  %v491_v20 = vunpack.c.l.s4 %v3418_v19  ;;  %s3419_s5 = smov 126   ;;  %s3421_s24 = smov 32   ;;  %vm1992_vm3 = vcmask 130048   ;;  %vm1998_vm4 = vcmask 261120  }
  0x58   : > { %245 = vst.msk [vmem:[#allocation2 + $0x50] sm:$0xff] %vm233_vm0, %v4546_v0  ;;  %269 = vrot.lane.b32.xlu1 %v250_v3, %s3416_s20  ;;  %s3422_s26 = smov 64   ;;  %s3423_s18 = smov 96   ;;  %vm2004_vm5 = vcmask 392192   ;;  %vm2010_vm6 = vcmask 523264   ;;  %vm2016_vm7 = vcmask 654336  }
  0x59   : > { %240 = vst.msk [vmem:[#allocation2 + $0x28] sm:$0x3] %vm236_vm1, %v4546_v0  ;;  %237 = vst.msk [vmem:[#allocation2 + $0x10] sm:$0x3] %vm236_vm1, %v4546_v0  ;;  %265 = vrot.lane.b32.xlu0 %v248_v4, %s3416_s20  ;;  %v492_v33 = vunpack.c.0.s8 %v491_v20  ;;  %s3424_s6 = smov 16   ;;  %s3425_s7 = smov 48  }
  0x5a   : > { %243 = vst.msk [vmem:[#allocation2 + $0x40] sm:$0x3] %vm236_vm1, %v4546_v0  ;;  %246 = vst.msk [vmem:[#allocation2 + $0x58] sm:$0x3] %vm236_vm1, %v4546_v0  ;;  %s3426_s8 = smov 80   ;;  %s3427_s9 = smov 112  }
  0x5b   : > { %v3643_v47 = vsub.s32 %v492_v33, %v3628_v34  ;;  %v3420_v33 = vmov 1934713408   ;;  %vm2022_vm8 = vcmask 785408   ;;  %vm2028_vm9 = vcmask 916480   ;;  %p228_p6 = scmp.lt.s32.totalorder %s3473_s19, 1 }
  0x5c   : > { %273 = vrot.lane.b32.xlu1 %v252_v5, %s3416_s20  ;;  %vm2080_vm10 = vcmask 1043456   ;;  %vm2076_vm11 = vcmask 293888  }
  0x5d   : > { %271 = vrot.lane.b32.xlu0 %v251_v6, %s3416_s20  ;;  %s4607_s19 = smov (!%p228_p6, %s3473_s19), 1 }
  0x5e   : > { %s2813_s15 = sshll.u32 %s4607_s19, 5 }
  0x5f   : > { %s232_s29 = scalar_lea.vmem %s4542_s4, %s2813_s15 }
  0x60   : > { %277 = vrot.lane.b32.xlu1 %v254_v7, %s3416_s20 }
  0x61   : > { %275 = vrot.lane.b32.xlu0 %v253_v8, %s3416_s20 }
  0xc6   : > { %v268_v9 = vpop.permute.xlu1 %267 }
  0xc7   : > { %v264_v10 = vpop.permute.xlu0 %263  ;;  %290 = vst.msk [vmem:[#allocation2 + $0x19] sm:$0xff] %vm287_vm2, %v268_v9 }
  0xc8   : > { %288 = vst.msk [vmem:[#allocation2 + $0x1] sm:$0xff] %vm287_vm2, %v264_v10 }
  0xca   : > { %v270_v11 = vpop.permute.xlu1 %269 }
  0xcb   : > { %v266_v12 = vpop.permute.xlu0 %265  ;;  %291 = vst.msk [vmem:[#allocation2 + $0x21] sm:$0xff] %vm287_vm2, %v270_v11 }
  0xcc   : > { %289 = vst.msk [vmem:[#allocation2 + $0x9] sm:$0xff] %vm287_vm2, %v266_v12 }
  0xce   : > { %v274_v13 = vpop.permute.xlu1 %273  ;;  %v3630_v35 = vld [vmem:[#allocation2 + $0x18] sm:$0xff] }
  0xcf   : > { %v272_v14 = vpop.permute.xlu0 %271  ;;  %293 = vst.msk [vmem:[#allocation2 + $0x39] sm:$0xff] %vm287_vm2, %v274_v13  ;;  %v3611_v22 = vld [vmem:[#allocation2] sm:$0xff] }
  0xd0   : > { %292 = vst.msk [vmem:[#allocation2 + $0x31] sm:$0xff] %vm287_vm2, %v272_v14  ;;  %v3647_v49 = vld [vmem:[#allocation2 + $0x1] sm:$0xff]  ;;  %v3654_v51 = vld [vmem:[#allocation2 + $0x19] sm:$0xff] }
  0xd2   : > { %v278_v15 = vpop.permute.xlu1 %277  ;;  %v299_v17 = vld [vmem:[#allocation2 + $0x20] sm:$0xff] }
  0xd3   : > { %v276_v16 = vpop.permute.xlu0 %275  ;;  %v297_v18 = vld [vmem:[#allocation2 + $0x8] sm:$0xff]  ;;  %295 = vst.msk [vmem:[#allocation2 + $0x51] sm:$0xff] %vm287_vm2, %v278_v15  ;;  %334 = vrot.lane.b32.xlu1 %v299_v17, %s3417_s21 }
  0xd4   : > { %294 = vst.msk [vmem:[#allocation2 + $0x49] sm:$0xff] %vm287_vm2, %v276_v16  ;;  %330 = vrot.lane.b32.xlu0 %v297_v18, %s3417_s21  ;;  %v3622_v30 = vld [vmem:[#allocation2 + $0x9] sm:$0xff]  ;;  %v307_v42 = vld [vmem:[#allocation2 + $0x21] sm:$0xff] }
  0xd6   : > { %v3615_v25 = vld [vmem:[#allocation2 + $0x39] sm:$0xff] }
  0xd7   : > { %v301_v23 = vld [vmem:[#allocation2 + $0x38] sm:$0xff]  ;;  %v3613_v24 = vld [vmem:[#allocation2 + $0x30] sm:$0xff]  ;;  %v1268_v31 = vcombine.low %v3622_v30, %v3615_v25  ;;  %v1269_v32 = vcombine.high %v3622_v30, %v3615_v25 }
  0xd8   : > { %338 = vrot.lane.b32.xlu0 %v301_v23, %s3417_s21  ;;  %v1100_v26 = vcombine.low %v297_v18, %v301_v23  ;;  %v1101_v27 = vcombine.high %v297_v18, %v301_v23  ;;  %v488_v28 = vcombine.low %v3611_v22, %v3613_v24  ;;  %v489_v29 = vcombine.high %v3611_v22, %v3613_v24  ;;  %v3640_v46 = vld [vmem:[#allocation2 + $0x31] sm:$0xff] }
  0xd9   : > { %v656_v52 = vcombine.low %v3647_v49, %v3640_v46  ;;  %v657_v53 = vcombine.high %v3647_v49, %v3640_v46  ;;  %v3686_v63 = vrot.slane %v1268_v31, %v3643_v47  ;;  %v3689_v1 = vrot.slane %v1269_v32, %v3643_v47 }
  0xda   : > { %v3632_v38 = vld [vmem:[#allocation2 + $0x51] sm:$0xff]  ;;  %v3671_v58 = vrot.slane %v1100_v26, %v3643_v47  ;;  %v3674_v59 = vrot.slane %v1101_v27, %v3643_v47  ;;  %v3683_v62 = vrot.slane %v488_v28, %v3643_v47  ;;  %v3727_v14 = vrot.slane %v489_v29, %v3643_v47  ;;  %v3776_v27 = vld [vmem:[#allocation2 + $0x3a] sm:$0xff] }
  0xdb   : > { %v303_v36 = vld [vmem:[#allocation2 + $0x50] sm:$0xff]  ;;  %v302_v37 = vld [vmem:[#allocation2 + $0x48] sm:$0xff]  ;;  %v1284_v44 = vcombine.low %v307_v42, %v3632_v38  ;;  %v1285_v45 = vcombine.high %v307_v42, %v3632_v38  ;;  %v3701_v4 = vrot.slane %v656_v52, %v3643_v47  ;;  %v3730_v15 = vrot.slane %v657_v53, %v3643_v47  ;;  %v3806_v29 = vld [vmem:[#allocation2 + $0x1a] sm:$0xff] }
  0xdc   : > { %342 = vrot.lane.b32.xlu1 %v303_v36, %s3417_s21  ;;  %v1116_v39 = vcombine.low %v299_v17, %v303_v36  ;;  %v1117_v40 = vcombine.high %v299_v17, %v303_v36  ;;  %354 = vrot.lane.b32.xlu0 %v297_v18, %s3419_s5  ;;  %v504_v41 = vcombine.low %v3630_v35, %v302_v37  ;;  %v3645_v48 = vld [vmem:[#allocation2 + $0x49] sm:$0xff]  ;;  %v3782_v28 = vld [vmem:[#allocation2 + $0x52] sm:$0xff] }
  0xdd   : > { %v505_v43 = vcombine.high %v3630_v35, %v302_v37  ;;  %v3664_v55 = vrot.slane %v1284_v44, %v3643_v47  ;;  %v672_v56 = vcombine.low %v3654_v51, %v3645_v48  ;;  %v673_v57 = vcombine.high %v3654_v51, %v3645_v48  ;;  %v3814_v31 = vld [vmem:[#allocation2 + $0x4a] sm:$0xff] }
  0xde   : > { %v3650_v50 = vrot.slane %v1116_v39, %v3643_v47  ;;  %v3661_v54 = vrot.slane %v504_v41, %v3643_v47  ;;  %v3677_v60 = vrot.slane %v1117_v40, %v3643_v47  ;;  %v3680_v61 = vrot.slane %v1285_v45, %v3643_v47 }
  0xdf   : > { %v3692_v2 = vrot.slane %v672_v56, %v3643_v47  ;;  %v3698_v3 = vrot.slane %v505_v43, %v3643_v47  ;;  %v1332_v6 = vcombine.low %v3686_v63, %v3664_v55  ;;  %v1333_v8 = vcombine.high %v3686_v63, %v3664_v55 }
  0xe0   : > { %358 = vrot.lane.b32.xlu1 %v299_v17, %s3419_s5  ;;  %362 = vrot.lane.b32.xlu0 %v301_v23, %s3419_s5  ;;  %v1164_v5 = vcombine.low %v3671_v58, %v3650_v50  ;;  %v1165_v7 = vcombine.high %v3671_v58, %v3650_v50  ;;  %v552_v9 = vcombine.low %v3683_v62, %v3661_v54 }
  0xe1   : > { %v3714_v10 = vrot.slane %v673_v57, %v3643_v47  ;;  %v720_v11 = vcombine.low %v3701_v4, %v3692_v2  ;;  %v1180_v12 = vcombine.low %v3674_v59, %v3677_v60  ;;  %v1348_v13 = vcombine.low %v3689_v1, %v3680_v61 }
  0xe2   : > { %v553_v16 = vcombine.high %v3683_v62, %v3661_v54  ;;  %v721_v17 = vcombine.high %v3701_v4, %v3692_v2  ;;  %v568_v18 = vcombine.low %v3727_v14, %v3698_v3  ;;  %v1181_v20 = vcombine.high %v3674_v59, %v3677_v60 }
  0xe3   : > { %v736_v19 = vcombine.low %v3730_v15, %v3714_v10  ;;  %v1349_v21 = vcombine.high %v3689_v1, %v3680_v61  ;;  %v569_v23 = vcombine.high %v3727_v14, %v3698_v3  ;;  %v737_v26 = vcombine.high %v3730_v15, %v3714_v10 }
  0xe4   : > { %366 = vrot.lane.b32.xlu1 %v303_v36, %s3419_s5  ;;  %328 = vrot.lane.b32.xlu0 %v3611_v22, %s3417_s21 }
  0xe8   : > { %332 = vrot.lane.b32.xlu1 %v3630_v35, %s3417_s21  ;;  %336 = vrot.lane.b32.xlu0 %v3613_v24, %s3417_s21 }
  0xec   : > { %340 = vrot.lane.b32.xlu1 %v302_v37, %s3417_s21  ;;  %352 = vrot.lane.b32.xlu0 %v3611_v22, %s3419_s5  ;;  %v3768_v22 = vld [vmem:[#allocation2 + $0xa] sm:$0xff] }
  0xf0   : > { %356 = vrot.lane.b32.xlu1 %v3630_v35, %s3419_s5  ;;  %360 = vrot.lane.b32.xlu0 %v3613_v24, %s3419_s5  ;;  %v3774_v24 = vld [vmem:[#allocation2 + $0x22] sm:$0xff]  ;;  %v555_v35 = vunpack.c.l.s4 %v3420_v33 }
  0xf2   : > { %v556_v40 = vunpack.c.0.s8 %v555_v35 }
  0xf4   : > { %364 = vrot.lane.b32.xlu1 %v302_v37, %s3419_s5  ;;  %386 = vrot.lane.b32.xlu0 %v3622_v30, %s3417_s21  ;;  %v3835_v45 = vsub.s32 %v556_v40, %v3628_v34 }
  0xf6   : > { %v3845_v34 = vrot.slane %v1164_v5, %v3835_v45  ;;  %v1188_v50 = vrot.slane %v1180_v12, %v3835_v45  ;;  %v3869_v58 = vrot.slane %v1181_v20, %v3835_v45  ;;  %v3905_v55 = vrot.slane %v553_v16, %v3835_v45 }
  0xf7   : > { %v3919_v54 = vrot.slane %v568_v18, %v3835_v45  ;;  %v1363_v62 = vrot.slane %v1349_v21, %v3835_v45  ;;  %v744_v2 = vrot.slane %v736_v19, %v3835_v45  ;;  %v751_v4 = vrot.slane %v737_v26, %v3835_v45 }
  0xf8   : > { %390 = vrot.lane.b32.xlu1 %v307_v42, %s3417_s21  ;;  %394 = vrot.lane.b32.xlu0 %v3615_v25, %s3417_s21  ;;  %4564 = vst [vmem:[#allocation9_spill] sm:$0xff] %v3845_v34 }
  0xfc   : > { %398 = vrot.lane.b32.xlu1 %v3632_v38, %s3417_s21  ;;  %410 = vrot.lane.b32.xlu0 %v3622_v30, %s3419_s5  ;;  %v3808_v30 = vld [vmem:[#allocation2 + $0x32] sm:$0xff] }
 0x100   : > { %414 = vrot.lane.b32.xlu1 %v307_v42, %s3419_s5  ;;  %418 = vrot.lane.b32.xlu0 %v3615_v25, %s3419_s5  ;;  %v3800_v25 = vld [vmem:[#allocation2 + $0x2] sm:$0xff] }
 0x104   : > { %422 = vrot.lane.b32.xlu1 %v3632_v38, %s3419_s5  ;;  %442 = vrot.lane.b32.xlu0 %v3768_v22, %s3417_s21 }
 0x108   : > { %446 = vrot.lane.b32.xlu1 %v3774_v24, %s3417_s21  ;;  %450 = vrot.lane.b32.xlu0 %v3776_v27, %s3417_s21 }
 0x10c   : > { %454 = vrot.lane.b32.xlu1 %v3782_v28, %s3417_s21  ;;  %384 = vrot.lane.b32.xlu0 %v3647_v49, %s3417_s21 }
 0x110   : > { %388 = vrot.lane.b32.xlu1 %v3654_v51, %s3417_s21  ;;  %392 = vrot.lane.b32.xlu0 %v3640_v46, %s3417_s21 }
 0x114   : > { %396 = vrot.lane.b32.xlu1 %v3645_v48, %s3417_s21  ;;  %408 = vrot.lane.b32.xlu0 %v3647_v49, %s3419_s5 }
 0x118   : > { %412 = vrot.lane.b32.xlu1 %v3654_v51, %s3419_s5  ;;  %416 = vrot.lane.b32.xlu0 %v3640_v46, %s3419_s5 }
 0x11c   : > { %420 = vrot.lane.b32.xlu1 %v3645_v48, %s3419_s5  ;;  %440 = vrot.lane.b32.xlu0 %v3800_v25, %s3417_s21 }
 0x120   : > { %444 = vrot.lane.b32.xlu1 %v3806_v29, %s3417_s21  ;;  %448 = vrot.lane.b32.xlu0 %v3808_v30, %s3417_s21 }
 0x124   : > { %452 = vrot.lane.b32.xlu1 %v3814_v31, %s3417_s21  ;;  %466 = vrot.lane.b32.xlu0 %v3768_v22, %s3419_s5 }
 0x128   : > { %470 = vrot.lane.b32.xlu1 %v3774_v24, %s3419_s5  ;;  %474 = vrot.lane.b32.xlu0 %v3776_v27, %s3419_s5 }
 0x12c   : > { %478 = vrot.lane.b32.xlu1 %v3782_v28, %s3419_s5  ;;  %464 = vrot.lane.b32.xlu0 %v3800_v25, %s3419_s5 }
 0x130   : > { %468 = vrot.lane.b32.xlu1 %v3806_v29, %s3419_s5  ;;  %472 = vrot.lane.b32.xlu0 %v3808_v30, %s3419_s5 }
 0x134   : > { %476 = vrot.lane.b32.xlu1 %v3814_v31, %s3419_s5 }
 0x145   : > { %v335_v36 = vpop.permute.xlu1 %334 }
 0x146   : > { %v331_v32 = vpop.permute.xlu0 %330 }
 0x14a   : > { %v339_v37 = vpop.permute.xlu0 %338 }
 0x14b   : > { %v1132_v38 = vcombine.low %v331_v32, %v339_v37  ;;  %v1133_v39 = vcombine.high %v331_v32, %v339_v37 }
 0x14d   : > { %v1140_v46 = vrot.slane %v1132_v38, %v3643_v47  ;;  %v1147_v48 = vrot.slane %v1133_v39, %v3643_v47 }
 0x14e   : > { %v343_v41 = vpop.permute.xlu1 %342  ;;  %v355_v42 = vpop.permute.xlu0 %354 }
 0x14f   : > { %v1148_v43 = vcombine.low %v335_v36, %v343_v41  ;;  %v1149_v44 = vcombine.high %v335_v36, %v343_v41  ;;  %v1179_v36 = vrot.slane %v1165_v7, %v3835_v45 }
 0x151   : > { %v1156_v49 = vrot.slane %v1148_v43, %v3643_v47  ;;  %v1163_v51 = vrot.slane %v1149_v44, %v3643_v47 }
 0x152   : > { %v359_v52 = vpop.permute.xlu1 %358  ;;  %v363_v53 = vpop.permute.xlu0 %362 }
 0x153   : > { %v1196_v56 = vcombine.low %v1140_v46, %v1156_v49  ;;  %v1197_v57 = vcombine.high %v1140_v46, %v1156_v49  ;;  %v1212_v32 = vcombine.low %v1147_v48, %v1163_v51  ;;  %v1213_v33 = vcombine.high %v1147_v48, %v1163_v51 }
 0x154   : > { %v1236_v35 = vcombine.low %v355_v42, %v363_v53  ;;  %v1237_v37 = vcombine.high %v355_v42, %v363_v53 }
 0x155   : > { %v3852_v38 = vrot.slane %v1196_v56, %v3835_v45  ;;  %v1211_v39 = vrot.slane %v1197_v57, %v3835_v45  ;;  %v1220_v40 = vrot.slane %v1212_v32, %v3835_v45  ;;  %v3857_v41 = vrot.slane %v1213_v33, %v3835_v45 }
 0x156   : > { %v1244_v42 = vrot.slane %v1236_v35, %v3643_v47  ;;  %v1251_v5 = vrot.slane %v1237_v37, %v3643_v47  ;;  %v367_v43 = vpop.permute.xlu1 %366  ;;  %v329_v44 = vpop.permute.xlu0 %328  ;;  %v3885_v33 = vrot.slane %v1332_v6, %v3835_v45  ;;  %v1347_v35 = vrot.slane %v1333_v8, %v3835_v45 }
 0x157   : > { %4565 = vst [vmem:[#allocation10_spill] sm:$0xff] %v3852_v38  ;;  %v1252_v7 = vcombine.low %v359_v52, %v367_v43  ;;  %v1253_v46 = vcombine.high %v359_v52, %v367_v43  ;;  %v1229_v48 = vcombine.high %v3845_v34, %v3852_v38  ;;  %v1230_v51 = vcombine.low %v1179_v36, %v1211_v39 }
 0x158   : > { %v1231_v53 = vcombine.high %v1179_v36, %v1211_v39  ;;  %v1232_v56 = vcombine.low %v1188_v50, %v1220_v40  ;;  %v1233_v57 = vcombine.high %v1188_v50, %v1220_v40  ;;  %v1234_v59 = vcombine.low %v3869_v58, %v3857_v41  ;;  %4566 = vst [vmem:[#allocation11_spill] sm:$0xff] %v3885_v33 }
 0x159   : > { %v1260_v12 = vrot.slane %v1252_v7, %v3643_v47  ;;  %v1267_v32 = vrot.slane %v1253_v46, %v3643_v47  ;;  %v1235_v60 = vcombine.high %v3869_v58, %v3857_v41  ;;  %v3895_v37 = vrot.slane %v552_v9, %v3835_v45 }
 0x15a   : > { %v333_v20 = vpop.permute.xlu1 %332  ;;  %v337_v52 = vpop.permute.xlu0 %336  ;;  %v1356_v6 = vrot.slane %v1348_v13, %v3835_v45 }
 0x15b   : > { %4567 = vst [vmem:[#allocation12_spill] sm:$0xff] %v3895_v37  ;;  %v1300_v36 = vcombine.low %v1244_v42, %v1260_v12  ;;  %v1301_v39 = vcombine.high %v1244_v42, %v1260_v12  ;;  %v1316_v40 = vcombine.low %v1251_v5, %v1267_v32  ;;  %v1317_v41 = vcombine.high %v1251_v5, %v1267_v32 }
 0x15c   : > { %v520_v43 = vcombine.low %v329_v44, %v337_v52  ;;  %v521_v50 = vcombine.high %v329_v44, %v337_v52 }
 0x15d   : > { %v3908_v63 = vrot.slane %v1300_v36, %v3835_v45  ;;  %v1315_v8 = vrot.slane %v1301_v39, %v3835_v45  ;;  %v1324_v9 = vrot.slane %v1316_v40, %v3835_v45  ;;  %v1331_v42 = vrot.slane %v1317_v41, %v3835_v45 }
 0x15e   : > { %v528_v5 = vrot.slane %v520_v43, %v3643_v47  ;;  %v535_v44 = vrot.slane %v521_v50, %v3643_v47  ;;  %v341_v13 = vpop.permute.xlu1 %340  ;;  %v353_v58 = vpop.permute.xlu0 %352 }
 0x15f   : > { %4568 = vst [vmem:[#allocation13_spill] sm:$0xff] %v3908_v63  ;;  %v536_v16 = vcombine.low %v333_v20, %v341_v13  ;;  %v537_v7 = vcombine.high %v333_v20, %v341_v13  ;;  %v1365_v12 = vcombine.high %v3908_v63, %v3885_v33  ;;  %v1366_v32 = vcombine.low %v1315_v8, %v1347_v35 }
 0x160   : > { %v1367_v52 = vcombine.high %v1315_v8, %v1347_v35  ;;  %v1368_v36 = vcombine.low %v1324_v9, %v1356_v6  ;;  %v1369_v39 = vcombine.high %v1324_v9, %v1356_v6  ;;  %v1370_v61 = vcombine.low %v1331_v42, %v1363_v62 }
 0x161   : > { %v544_v18 = vrot.slane %v536_v16, %v3643_v47  ;;  %v551_v40 = vrot.slane %v537_v7, %v3643_v47  ;;  %v3931_v41 = vpack.i.bf16 %v1365_v12, %v1229_v48  ;;  %v3933_v20 = vpack.i.bf16 %v1366_v32, %v1230_v51 }
 0x162   : > { %v357_v1 = vpop.permute.xlu1 %356  ;;  %v361_v21 = vpop.permute.xlu0 %360  ;;  %v3935_v43 = vpack.i.bf16 %v1367_v52, %v1231_v53  ;;  %v3937_v50 = vpack.i.bf16 %v1368_v36, %v1232_v56  ;;  %v3939_v13 = vpack.i.bf16 %v1369_v39, %v1233_v57  ;;  %v3941_v7 = vpack.i.bf16 %v1370_v61, %v1234_v59 }
 0x163   : > { %v584_v35 = vcombine.low %v528_v5, %v544_v18  ;;  %v585_v8 = vcombine.high %v528_v5, %v544_v18  ;;  %v600_v6 = vcombine.low %v535_v44, %v551_v40  ;;  %v601_v9 = vcombine.high %v535_v44, %v551_v40 }
 0x164   : > { %v624_v16 = vcombine.low %v353_v58, %v361_v21  ;;  %v625_v49 = vcombine.high %v353_v58, %v361_v21  ;;  %v1371_v48 = vcombine.high %v1331_v42, %v1363_v62  ;;  %v3957_v59 = vrot.slane %v569_v23, %v3835_v45 }
 0x165   : > { %v3944_v12 = vrot.slane %v584_v35, %v3835_v45  ;;  %v599_v51 = vrot.slane %v585_v8, %v3835_v45  ;;  %v608_v53 = vrot.slane %v600_v6, %v3835_v45  ;;  %v3949_v56 = vrot.slane %v601_v9, %v3835_v45 }
 0x166   : > { %v632_v57 = vrot.slane %v624_v16, %v3643_v47  ;;  %v639_v5 = vrot.slane %v625_v49, %v3643_v47  ;;  %v365_v44 = vpop.permute.xlu1 %364  ;;  %v387_v32 = vpop.permute.xlu0 %386  ;;  %v3959_v42 = vpack.i.bf16 %v1371_v48, %v1235_v60  ;;  %v1508_v61 = vcombine.low %v3768_v22, %v3776_v27 }
 0x167   : > { %4569 = vst [vmem:[#allocation14_spill] sm:$0xff] %v3944_v12  ;;  %v640_v58 = vcombine.low %v357_v1, %v365_v44  ;;  %v641_v62 = vcombine.high %v357_v1, %v365_v44  ;;  %v617_v52 = vcombine.high %v3895_v37, %v3944_v12  ;;  %v618_v49 = vcombine.low %v3905_v55, %v599_v51 }
 0x168   : > { %4570 = vst [vmem:[#allocation15_spill] sm:$0xff] %v3959_v42  ;;  %v619_v39 = vcombine.high %v3905_v55, %v599_v51  ;;  %v620_v18 = vcombine.low %v3919_v54, %v608_v53  ;;  %v621_v3 = vcombine.high %v3919_v54, %v608_v53  ;;  %v622_v60 = vcombine.low %v3957_v59, %v3949_v56 }
 0x169   : > { %v648_v14 = vrot.slane %v640_v58, %v3643_v47  ;;  %v655_v23 = vrot.slane %v641_v62, %v3643_v47  ;;  %v623_v40 = vcombine.high %v3957_v59, %v3949_v56  ;;  %v1524_v55 = vcombine.low %v3774_v24, %v3782_v28 }
 0x16a   : > { %v391_v1 = vpop.permute.xlu1 %390  ;;  %v395_v21 = vpop.permute.xlu0 %394  ;;  %v3983_v48 = vrot.slane %v720_v11, %v3835_v45  ;;  %v735_v51 = vrot.slane %v721_v17, %v3835_v45 }
 0x16b   : > { %v688_v35 = vcombine.low %v632_v57, %v648_v14  ;;  %v689_v54 = vcombine.high %v632_v57, %v648_v14  ;;  %v704_v8 = vcombine.low %v639_v5, %v655_v23  ;;  %v705_v6 = vcombine.high %v639_v5, %v655_v23 }
 0x16c   : > { %v1372_v9 = vcombine.low %v387_v32, %v395_v21  ;;  %v1373_v16 = vcombine.high %v387_v32, %v395_v21  ;;  %4571 = vst [vmem:[#allocation16_spill] sm:$0xff] %v3983_v48 }
 0x16d   : > { %v3990_v53 = vrot.slane %v688_v35, %v3835_v45  ;;  %v703_v56 = vrot.slane %v689_v54, %v3835_v45  ;;  %v712_v57 = vrot.slane %v704_v8, %v3835_v45  ;;  %v719_v5 = vrot.slane %v705_v6, %v3835_v45 }
 0x16e   : > { %v1380_v44 = vrot.slane %v1372_v9, %v3643_v47  ;;  %v3997_v32 = vrot.slane %v1373_v16, %v3643_v47  ;;  %v399_v11 = vpop.permute.xlu1 %398  ;;  %v411_v59 = vpop.permute.xlu0 %410 }
 0x16f   : > { %4572 = vst [vmem:[#allocation17_spill] sm:$0xff] %v3990_v53  ;;  %v1388_v17 = vcombine.low %v391_v1, %v399_v11  ;;  %v1389_v58 = vcombine.high %v391_v1, %v399_v11  ;;  %v753_v14 = vcombine.high %v3990_v53, %v3983_v48  ;;  %v754_v23 = vcombine.low %v703_v56, %v735_v51 }
 0x170   : > { %v755_v21 = vcombine.high %v703_v56, %v735_v51  ;;  %v756_v35 = vcombine.low %v712_v57, %v744_v2  ;;  %v757_v54 = vcombine.high %v712_v57, %v744_v2  ;;  %v758_v10 = vcombine.low %v719_v5, %v751_v4 }
 0x171   : > { %v1396_v8 = vrot.slane %v1388_v17, %v3643_v47  ;;  %v1403_v19 = vrot.slane %v1389_v58, %v3643_v47  ;;  %v4013_v6 = vpack.i.bf16 %v753_v14, %v617_v52  ;;  %v4015_v1 = vpack.i.bf16 %v754_v23, %v618_v49 }
 0x172   : > { %v415_v15 = vpop.permute.xlu1 %414  ;;  %v419_v26 = vpop.permute.xlu0 %418  ;;  %v4017_v9 = vpack.i.bf16 %v755_v21, %v619_v39  ;;  %v4019_v16 = vpack.i.bf16 %v756_v35, %v620_v18  ;;  %v4021_v11 = vpack.i.bf16 %v757_v54, %v621_v3  ;;  %v4025_v58 = vpack.i.bf16 %v758_v10, %v622_v60 }
 0x173   : > { %v1436_v51 = vcombine.low %v1380_v44, %v1396_v8  ;;  %v1437_v56 = vcombine.high %v1380_v44, %v1396_v8  ;;  %v1452_v57 = vcombine.low %v3997_v32, %v1403_v19  ;;  %v1453_v2 = vcombine.high %v3997_v32, %v1403_v19 }
 0x174   : > { %v1404_v17 = vcombine.low %v411_v59, %v419_v26  ;;  %v1405_v52 = vcombine.high %v411_v59, %v419_v26  ;;  %v759_v14 = vcombine.high %v719_v5, %v751_v4  ;;  %v1509_v49 = vcombine.high %v3768_v22, %v3776_v27 }
 0x175   : > { %v1525_v39 = vcombine.high %v3774_v24, %v3782_v28  ;;  %v4032_v18 = vrot.slane %v1524_v55, %v3643_v47  ;;  %v4037_v59 = vrot.slane %v1508_v61, %v3643_v47  ;;  %v4048_v19 = vrot.slane %v1436_v51, %v3835_v45 }
 0x176   : > { %v423_v3 = vpop.permute.xlu1 %422  ;;  %v443_v44 = vpop.permute.xlu0 %442  ;;  %v4034_v23 = vpack.i.bf16 %v759_v14, %v623_v40  ;;  %v1412_v60 = vrot.slane %v1404_v17, %v3643_v47  ;;  %v1419_v5 = vrot.slane %v1405_v52, %v3643_v47  ;;  %v1523_v27 = vrot.slane %v1509_v49, %v3643_v47 }
 0x177   : > { %v1420_v21 = vcombine.low %v415_v15, %v423_v3  ;;  %v1421_v32 = vcombine.high %v415_v15, %v423_v3  ;;  %v1539_v28 = vrot.slane %v1525_v39, %v3643_v47  ;;  %v1572_v4 = vcombine.low %v4037_v59, %v4032_v18 }
 0x178   : > { %4573 = vst [vmem:[#allocation18_spill] sm:$0xff] %v4034_v23  ;;  %v4051_v10 = vrot.slane %v1437_v56, %v3835_v45  ;;  %v1460_v39 = vrot.slane %v1452_v57, %v3835_v45  ;;  %v1467_v51 = vrot.slane %v1453_v2, %v3835_v45 }
 0x179   : > { %v1428_v22 = vrot.slane %v1420_v21, %v3643_v47  ;;  %v1435_v24 = vrot.slane %v1421_v32, %v3643_v47  ;;  %v1589_v62 = vcombine.high %v1523_v27, %v1539_v28 }
 0x17a   : > { %v447_v55 = vpop.permute.xlu1 %446  ;;  %v451_v40 = vpop.permute.xlu0 %450 }
 0x17b   : > { %v1468_v35 = vcombine.low %v1412_v60, %v1428_v22  ;;  %v1469_v61 = vcombine.high %v1412_v60, %v1428_v22  ;;  %v1484_v54 = vcombine.low %v1419_v5, %v1435_v24  ;;  %v1485_v8 = vcombine.high %v1419_v5, %v1435_v24 }
 0x17c   : > { %v1540_v15 = vcombine.low %v443_v44, %v451_v40  ;;  %v1541_v26 = vcombine.high %v443_v44, %v451_v40 }
 0x17d   : > { %v4054_v17 = vrot.slane %v1468_v35, %v3835_v45  ;;  %v4057_v52 = vrot.slane %v1469_v61, %v3835_v45  ;;  %v1492_v14 = vrot.slane %v1484_v54, %v3835_v45  ;;  %v1499_v49 = vrot.slane %v1485_v8, %v3835_v45 }
 0x17e   : > { %v4064_v3 = vrot.slane %v1540_v15, %v3643_v47  ;;  %v1555_v56 = vrot.slane %v1541_v26, %v3643_v47  ;;  %v455_v44 = vpop.permute.xlu1 %454  ;;  %v385_v21 = vpop.permute.xlu0 %384  ;;  %v1588_v26 = vcombine.low %v1523_v27, %v1539_v28  ;;  %v1603_v27 = vrot.slane %v1589_v62, %v3835_v45 }
 0x17f   : > { %v1556_v60 = vcombine.low %v447_v55, %v455_v44  ;;  %v1557_v5 = vcombine.high %v447_v55, %v455_v44  ;;  %v1504_v24 = vcombine.low %v1460_v39, %v1492_v14  ;;  %v1505_v40 = vcombine.high %v1460_v39, %v1492_v14 }
 0x180   : > { %v1506_v54 = vcombine.low %v1467_v51, %v1499_v49  ;;  %v1507_v8 = vcombine.high %v1467_v51, %v1499_v49 }
 0x181   : > { %v4076_v35 = vrot.slane %v1556_v60, %v3643_v47  ;;  %v1571_v61 = vrot.slane %v1557_v5, %v3643_v47  ;;  %v4087_v60 = vrot.slane %v1572_v4, %v3835_v45  ;;  %v1596_v5 = vrot.slane %v1588_v26, %v3835_v45 }
 0x182   : > { %v389_v15 = vpop.permute.xlu1 %388  ;;  %v393_v55 = vpop.permute.xlu0 %392 }
 0x183   : > { %v1604_v44 = vcombine.low %v4064_v3, %v4076_v35  ;;  %v1620_v32 = vcombine.low %v1555_v56, %v1571_v61  ;;  %v1621_v36 = vcombine.high %v1555_v56, %v1571_v61  ;;  %v761_v46 = vcombine.high %v385_v21, %v393_v55 }
 0x184   : > { %v760_v4 = vcombine.low %v385_v21, %v393_v55 }
 0x185   : > { %v4082_v0 = vrot.slane %v1604_v44, %v3835_v45  ;;  %v1628_v14 = vrot.slane %v1620_v32, %v3835_v45  ;;  %v1635_v39 = vrot.slane %v1621_v36, %v3835_v45  ;;  %v775_v32 = vrot.slane %v761_v46, %v3643_v47 }
 0x186   : > { %v397_v49 = vpop.permute.xlu1 %396  ;;  %v409_v51 = vpop.permute.xlu0 %408  ;;  %v4107_v21 = vrot.slane %v760_v4, %v3643_v47 }
 0x187   : > { %v777_v2 = vcombine.high %v389_v15, %v397_v49  ;;  %v776_v28 = vcombine.low %v389_v15, %v397_v49  ;;  %v1640_v61 = vcombine.low %v1596_v5, %v1628_v14  ;;  %v1641_v44 = vcombine.high %v1596_v5, %v1628_v14 }
 0x188   : > { %v1642_v57 = vcombine.low %v1603_v27, %v1635_v39  ;;  %v1643_v14 = vcombine.high %v1603_v27, %v1635_v39 }
 0x189   : > { %v791_v36 = vrot.slane %v777_v2, %v3643_v47  ;;  %v4095_v37 = vpack.i.bf16 %v1640_v61, %v1504_v24  ;;  %v4097_v26 = vpack.i.bf16 %v1641_v44, %v1505_v40  ;;  %v4100_v56 = vrot.slane %v776_v28, %v3643_v47 }
 0x18a   : > { %v413_v22 = vpop.permute.xlu1 %412  ;;  %v417_v12 = vpop.permute.xlu0 %416  ;;  %v4102_v15 = vpack.i.bf16 %v1642_v57, %v1506_v54  ;;  %v912_v2 = vcombine.low %v3806_v29, %v3814_v31  ;;  %v4109_v40 = vpack.i.bf16 %v1643_v14, %v1507_v8  ;;  %v896_v28 = vcombine.low %v3800_v25, %v3808_v30 }
 0x18b   : > { %4574 = vst [vmem:[#allocation19_spill] sm:$0xff] %v4097_v26  ;;  %v840_v48 = vcombine.low %v775_v32, %v791_v36  ;;  %v841_v53 = vcombine.high %v775_v32, %v791_v36  ;;  %v793_v62 = vcombine.high %v409_v51, %v417_v12  ;;  %v792_v46 = vcombine.low %v409_v51, %v417_v12 }
 0x18c   : > { %4575 = vst [vmem:[#allocation20_spill] sm:$0xff] %v4102_v15  ;;  %4576 = vst [vmem:[#allocation21_spill] sm:$0xff] %v4109_v40  ;;  %v824_v57 = vcombine.low %v4107_v21, %v4100_v56  ;;  %v897_v8 = vcombine.high %v3800_v25, %v3808_v30  ;;  %v4128_v27 = vrot.slane %v912_v2, %v3643_v47 }
 0x18d   : > { %v4116_v12 = vrot.slane %v792_v46, %v3643_v47  ;;  %v807_v54 = vrot.slane %v793_v62, %v3643_v47  ;;  %v4133_v62 = vrot.slane %v896_v28, %v3643_v47 }
 0x18e   : > { %v421_v24 = vpop.permute.xlu1 %420  ;;  %v441_v55 = vpop.permute.xlu0 %440  ;;  %v4136_v25 = vrot.slane %v824_v57, %v3835_v45  ;;  %v911_v2 = vrot.slane %v897_v8, %v3643_v47  ;;  %v855_v57 = vrot.slane %v841_v53, %v3835_v45 }
 0x18f   : > { %v808_v49 = vcombine.low %v413_v22, %v421_v24  ;;  %v809_v5 = vcombine.high %v413_v22, %v421_v24  ;;  %v913_v22 = vcombine.high %v3806_v29, %v3814_v31 }
 0x191   : > { %v4120_v39 = vrot.slane %v808_v49, %v3643_v47  ;;  %v823_v51 = vrot.slane %v809_v5, %v3643_v47  ;;  %v927_v24 = vrot.slane %v913_v22, %v3643_v47  ;;  %v848_v49 = vrot.slane %v840_v48, %v3835_v45 }
 0x192   : > { %v445_v61 = vpop.permute.xlu1 %444  ;;  %v449_v44 = vpop.permute.xlu0 %448 }
 0x193   : > { %v856_v32 = vcombine.low %v4116_v12, %v4120_v39  ;;  %v872_v36 = vcombine.low %v807_v54, %v823_v51  ;;  %v873_v4 = vcombine.high %v807_v54, %v823_v51  ;;  %v928_v14 = vcombine.low %v441_v55, %v449_v44 }
 0x194   : > { %v929_v46 = vcombine.high %v441_v55, %v449_v44  ;;  %v960_v55 = vcombine.low %v4133_v62, %v4128_v27  ;;  %v976_v63 = vcombine.low %v911_v2, %v927_v24  ;;  %v977_v54 = vcombine.high %v911_v2, %v927_v24 }
 0x195   : > { %v4139_v29 = vrot.slane %v856_v32, %v3835_v45  ;;  %v880_v30 = vrot.slane %v872_v36, %v3835_v45  ;;  %v887_v31 = vrot.slane %v873_v4, %v3835_v45  ;;  %v4152_v32 = vrot.slane %v928_v14, %v3643_v47 }
 0x196   : > { %v453_v5 = vpop.permute.xlu1 %452  ;;  %v467_v28 = vpop.permute.xlu0 %466  ;;  %v943_v8 = vrot.slane %v929_v46, %v3643_v47  ;;  %v4162_v46 = vrot.slane %v960_v55, %v3835_v45  ;;  %v984_v2 = vrot.slane %v976_v63, %v3835_v45  ;;  %v991_v24 = vrot.slane %v977_v54, %v3835_v45 }
 0x197   : > { %v944_v51 = vcombine.low %v445_v61, %v453_v5  ;;  %v945_v44 = vcombine.high %v445_v61, %v453_v5  ;;  %v892_v22 = vcombine.low %v848_v49, %v880_v30  ;;  %v893_v36 = vcombine.high %v848_v49, %v880_v30 }
 0x198   : > { %v894_v38 = vcombine.low %v855_v57, %v887_v31  ;;  %v895_v34 = vcombine.high %v855_v57, %v887_v31 }
 0x199   : > { %v4156_v48 = vrot.slane %v944_v51, %v3643_v47  ;;  %v959_v4 = vrot.slane %v945_v44, %v3643_v47 }
 0x19a   : > { %v471_v53 = vpop.permute.xlu1 %470  ;;  %v475_v33 = vpop.permute.xlu0 %474 }
 0x19b   : > { %v992_v61 = vcombine.low %v4152_v32, %v4156_v48  ;;  %v1008_v14 = vcombine.low %v943_v8, %v959_v4  ;;  %v1009_v5 = vcombine.high %v943_v8, %v959_v4  ;;  %v1644_v31 = vcombine.low %v467_v28, %v475_v33 }
 0x19c   : > { %v1645_v40 = vcombine.high %v467_v28, %v475_v33 }
 0x19d   : > { %v4165_v30 = vrot.slane %v992_v61, %v3835_v45  ;;  %v1016_v49 = vrot.slane %v1008_v14, %v3835_v45  ;;  %v1023_v51 = vrot.slane %v1009_v5, %v3835_v45  ;;  %v4174_v23 = vrot.slane %v1644_v31, %v3643_v47 }
 0x19e   : > { %v479_v57 = vpop.permute.xlu1 %478  ;;  %v465_v44 = vpop.permute.xlu0 %464  ;;  %v1659_v28 = vrot.slane %v1645_v40, %v3643_v47 }
 0x19f   : > { %v1660_v15 = vcombine.low %v471_v53, %v479_v57  ;;  %v1661_v8 = vcombine.high %v471_v53, %v479_v57  ;;  %v1028_v4 = vcombine.low %v984_v2, %v1016_v49  ;;  %v1029_v61 = vcombine.high %v984_v2, %v1016_v49 }
 0x1a0   : > { %v1030_v26 = vcombine.low %v991_v24, %v1023_v51  ;;  %v1031_v31 = vcombine.high %v991_v24, %v1023_v51 }
 0x1a1   : > { %v4177_v14 = vrot.slane %v1660_v15, %v3643_v47  ;;  %v1675_v5 = vrot.slane %v1661_v8, %v3643_v47  ;;  %v4180_v54 = vpack.i.bf16 %v1028_v4, %v892_v22  ;;  %v4182_v33 = vpack.i.bf16 %v1029_v61, %v893_v36 }
 0x1a2   : > { %v469_v63 = vpop.permute.xlu1 %468  ;;  %v473_v42 = vpop.permute.xlu0 %472  ;;  %v4187_v49 = vpack.i.bf16 %v1030_v26, %v894_v38  ;;  %v4192_v55 = vpack.i.bf16 %v1031_v31, %v895_v34  ;;  %v1025_v31 = vcombine.high %v4162_v46, %v4165_v30 }
 0x1a3   : > { %v1677_v53 = vcombine.high %v4174_v23, %v4177_v14  ;;  %v1692_v57 = vcombine.low %v1659_v28, %v1675_v5  ;;  %v1032_v15 = vcombine.low %v465_v44, %v473_v42  ;;  %v1033_v22 = vcombine.high %v465_v44, %v473_v42 }
 0x1a4   : > { %v1693_v40 = vcombine.high %v1659_v28, %v1675_v5 }
 0x1a5   : > { %v4190_v2 = vrot.slane %v1677_v53, %v3835_v45  ;;  %v4197_v38 = vrot.slane %v1032_v15, %v3643_v47  ;;  %v4204_v24 = vrot.slane %v1692_v57, %v3835_v45  ;;  %v1047_v34 = vrot.slane %v1033_v22, %v3643_v47 }
 0x1a6   : > { %v477_v8 = vpop.permute.xlu1 %476  ;;  %v4212_v61 = vrot.slane %v1693_v40, %v3835_v45  ;;  %v1637_v53 = vcombine.high %v4087_v60, %v4082_v0 }
 0x1a7   : > { %v1048_v4 = vcombine.low %v469_v63, %v477_v8  ;;  %v1049_v36 = vcombine.high %v469_v63, %v477_v8  ;;  %1885 = vrot.lane.b32.xlu0 %v4190_v2, %s3421_s24 }
 0x1a9   : > { %v4200_v26 = vrot.slane %v1048_v4, %v3643_v47  ;;  %v1063_v51 = vrot.slane %v1049_v36, %v3643_v47 }
 0x1ab   : > { %v1065_v42 = vcombine.high %v4197_v38, %v4200_v26  ;;  %1925 = vrot.lane.b32.xlu0 %v4204_v24, %s3422_s26  ;;  %v1080_v44 = vcombine.low %v1047_v34, %v1063_v51  ;;  %v1081_v47 = vcombine.high %v1047_v34, %v1063_v51  ;;  %v1064_v51 = vcombine.low %v4197_v38, %v4200_v26 }
 0x1ac   : > { %v4584_v34 = vmov 0.0  }
 0x1ad   : > { %v4215_v5 = vrot.slane %v1065_v42, %v3835_v45  ;;  %v4222_v63 = vrot.slane %v1080_v44, %v3835_v45  ;;  %v4229_v28 = vrot.slane %v1081_v47, %v3835_v45  ;;  %v1710_v26 = vcombine.high %v4204_v24, %v4584_v34  ;;  %v2167_v42 = vld [vmem:[#allocation5 + $0x48] sm:$0xff] }
 0x1ae   : > { %v3428_v44 = vmov 0  }
 0x1af   : > { %1965 = vrot.lane.b32.xlu0 %v4212_v61, %s3423_s18  ;;  %1745 = vrot.lane.b32.xlu1 %v4215_v5, %s3421_s24 }
 0x1b0   : > { %3286 = vset.pattern.permute.xlu0 %v3428_v44  ;;  %v2294_v44 = vld [vmem:[#allocation5 + $0x440] sm:$0xff] }
 0x1b3   : > { %3147 = vrot.lane.b32.xlu0 %v3931_v41, %s3424_s6  ;;  %1785 = vrot.lane.b32.xlu1 %v4222_v63, %s3422_s26  ;;  %v1605_v41 = vcombine.high %v4064_v3, %v4076_v35  ;;  %v4577_v3 = vcombine.high %v4048_v19, %v4054_v17 }
 0x1b5   : > { %v3186_v35 = vpack.i.bf16 %v1637_v53, %v4577_v3  ;;  %v2166_v53 = vld [vmem:[#allocation5 + $0x40] sm:$0xff]  ;;  %v1098_v3 = vcombine.high %v4222_v63, %v4584_v34 }
 0x1b7   : > { %3157 = vrot.lane.b32.xlu0 %v3933_v20, %s3421_s24  ;;  %1825 = vrot.lane.b32.xlu1 %v4229_v28, %s3423_s18  ;;  %v1573_v20 = vcombine.high %v4037_v59, %v4032_v18  ;;  %v889_v18 = vcombine.high %v4136_v25, %v4139_v29 }
 0x1b9   : > { %v1587_v59 = vrot.slane %v1573_v20, %v3835_v45  ;;  %v3196_v57 = vpack.i.bf16 %v1025_v31, %v889_v18  ;;  %v2175_v20 = vld [vmem:[#allocation5 + $0x88] sm:$0xff]  ;;  %v2190_v18 = vld [vmem:[#allocation5 + $0x100] sm:$0xff] }
 0x1ba   : > { %v2191_v31 = vld [vmem:[#allocation5 + $0x108] sm:$0xff] }
 0x1bb   : > { %3167 = vrot.lane.b32.xlu0 %v3935_v43, %s3425_s7  ;;  %3152 = vrot.lane.b32.xlu1 %v4013_v6, %s3424_s6  ;;  %v1619_v43 = vrot.slane %v1605_v41, %v3835_v45  ;;  %v993_v6 = vcombine.high %v4152_v32, %v4156_v48  ;;  %v825_v32 = vcombine.high %v4107_v21, %v4100_v56  ;;  %v2158_v41 = vld [vmem:[#allocation5] sm:$0xff] }
 0x1bc   : > { %v2824_v24 = vpack.c.bf16 %v2166_v53, %v2158_v41  ;;  %v2303_v41 = vld [vmem:[#allocation5 + $0x488] sm:$0xff] }
 0x1bd   : > { %v1007_v48 = vrot.slane %v993_v6, %v3835_v45  ;;  %v1639_v22 = vcombine.high %v1587_v59, %v1619_v43  ;;  %v2174_v6 = vld [vmem:[#allocation5 + $0x80] sm:$0xff]  ;;  %v2311_v53 = vld [vmem:[#allocation5 + $0x4c8] sm:$0xff] }
 0x1bf   : > { %3177 = vrot.lane.b32.xlu0 %v3937_v50, %s3422_s26  ;;  %3162 = vrot.lane.b32.xlu1 %v4015_v1, %s3421_s24  ;;  %v961_v50 = vcombine.high %v4133_v62, %v4128_v27  ;;  %v857_v1 = vcombine.high %v4116_v12, %v4120_v39  ;;  %v1638_v27 = vcombine.low %v1587_v59, %v1619_v43  ;;  %v2070_v43 = vld [vmem:[%s4540_s2] sm:$0x7] }
 0x1c0   : > { %v839_v12 = vrot.slane %v825_v32, %v3835_v45  ;;  %v4578_v39 = vcombine.low %v4051_v10, %v4057_v52  ;;  %v2198_v59 = vld [vmem:[#allocation5 + $0x140] sm:$0xff]  ;;  %v1099_v32 = vcombine.high %v4229_v28, %v4584_v34 }
 0x1c1   : > { %v871_v62 = vrot.slane %v857_v1, %v3835_v45 }
 0x1c2   : > { %v3206_v15 = vpack.i.bf16 %v1638_v27, %v4578_v39  ;;  %v2215_v27 = vld [vmem:[#allocation5 + $0x1c8] sm:$0xff] }
 0x1c3   : > { %3187 = vrot.lane.b32.xlu0 %v3186_v35, %s3424_s6  ;;  %3172 = vrot.lane.b32.xlu1 %v4017_v9, %s3425_s7  ;;  %v975_v9 = vrot.slane %v961_v50, %v3835_v45  ;;  %v890_v21 = vcombine.low %v839_v12, %v871_v62  ;;  %v891_v40 = vcombine.high %v839_v12, %v871_v62  ;;  %v2199_v50 = vld [vmem:[#allocation5 + $0x148] sm:$0xff]  ;;  %v2206_v62 = vld [vmem:[#allocation5 + $0x180] sm:$0xff] }
 0x1c4   : > { %v2830_v1 = vpack.c.bf16 %v2199_v50, %v2191_v31  ;;  %v2223_v39 = vld [vmem:[#allocation5 + $0x208] sm:$0xff]  ;;  %v2326_v31 = vld [vmem:[#allocation5 + $0x540] sm:$0xff] }
 0x1c5   : > { %v1026_v56 = vcombine.low %v975_v9, %v1007_v48  ;;  %v1027_v36 = vcombine.high %v975_v9, %v1007_v48  ;;  %v2832_v48 = vpack.c.bf16 %v2198_v59, %v2190_v18  ;;  %v2214_v9 = vld [vmem:[#allocation5 + $0x1c0] sm:$0xff]  ;;  %v2335_v18 = vld [vmem:[#allocation5 + $0x588] sm:$0xff] }
 0x1c6   : > { %v2836_v12 = vpack.c.bf16 %v2214_v9, %v2206_v62  ;;  %v2343_v59 = vld [vmem:[#allocation5 + $0x5c8] sm:$0xff] }
 0x1c7   : > { %3197 = vrot.lane.b32.xlu0 %v3196_v57, %s3424_s6  ;;  %3182 = vrot.lane.b32.xlu1 %v4019_v16, %s3422_s26  ;;  %v3216_v8 = vpack.i.bf16 %v1026_v56, %v890_v21  ;;  %v4579_v16 = vcombine.high %v4051_v10, %v4057_v52  ;;  %v1676_v10 = vcombine.low %v4174_v23, %v4177_v14  ;;  %v4581_v52 = vld [vmem:[#allocation19_spill] sm:$0xff]  ;;  %v2207_v57 = vld [vmem:[#allocation5 + $0x188] sm:$0xff]  ;;  %v2222_v21 = vld [vmem:[#allocation5 + $0x200] sm:$0xff] }
 0x1c8   : > { %v4316_v14 = vrot.slane %v1064_v51, %v3835_v45  ;;  %v2834_v63 = vpack.c.bf16 %v2215_v27, %v2207_v57  ;;  %v2262_v51 = vld [vmem:[#allocation5 + $0x340] sm:$0xff]  ;;  %v2351_v9 = vld [vmem:[#allocation5 + $0x608] sm:$0xff] }
 0x1c9   : > { %v3226_v4 = vpack.i.bf16 %v1639_v22, %v4579_v16  ;;  %v2239_v22 = vld [vmem:[#allocation5 + $0x288] sm:$0xff]  ;;  %v2342_v57 = vld [vmem:[#allocation5 + $0x5c0] sm:$0xff] }
 0x1ca   : > { %v1096_v38 = vcombine.high %v4316_v14, %v4584_v34  ;;  %v2247_v16 = vld [vmem:[#allocation5 + $0x2c8] sm:$0xff] }
 0x1cb   : > { %3207 = vrot.lane.b32.xlu0 %v3206_v15, %s3421_s24  ;;  %3192 = vrot.lane.b32.xlu1 %v3939_v13, %s3426_s8  ;;  %v3236_v13 = vpack.i.bf16 %v1027_v36, %v891_v40  ;;  %v2231_v15 = vld [vmem:[#allocation5 + $0x248] sm:$0xff]  ;;  %v2238_v36 = vld [vmem:[#allocation5 + $0x280] sm:$0xff] }
 0x1cc   : > { %v2838_v56 = vpack.c.bf16 %v2231_v15, %v2223_v39  ;;  %v2246_v40 = vld [vmem:[#allocation5 + $0x2c0] sm:$0xff] }
 0x1cd   : > { %v2350_v15 = vld [vmem:[#allocation5 + $0x600] sm:$0xff] }
 0x1cf   : > { %3217 = vrot.lane.b32.xlu0 %v3216_v8, %s3421_s24  ;;  %3202 = vrot.lane.b32.xlu1 %v4021_v11, %s3426_s8  ;;  %v4580_v11 = vld [vmem:[#allocation15_spill] sm:$0xff]  ;;  %v2230_v8 = vld [vmem:[#allocation5 + $0x240] sm:$0xff] }
 0x1d0   : > { %v2840_v28 = vpack.c.bf16 %v2230_v8, %v2222_v21 }
 0x1d3   : > { %3227 = vrot.lane.b32.xlu0 %v3226_v4, %s3425_s7  ;;  %3212 = vrot.lane.b32.xlu1 %v3941_v7, %s3423_s18  ;;  %v4582_v7 = vld [vmem:[#allocation18_spill] sm:$0xff]  ;;  %v2842_v4 = vpack.c.bf16 %v2247_v16, %v2239_v22 }
 0x1d4   : > { %v2367_v22 = vld [vmem:[#allocation5 + $0x688] sm:$0xff] }
 0x1d5   : > { %v2375_v16 = vld [vmem:[#allocation5 + $0x6c8] sm:$0xff] }
 0x1d7   : > { %3237 = vrot.lane.b32.xlu0 %v3236_v13, %s3425_s7  ;;  %3222 = vrot.lane.b32.xlu1 %v4025_v58, %s3423_s18  ;;  %v4307_v58 = vrot.slane %v1676_v10, %v3835_v45  ;;  %v4585_v45 = vld [vmem:[#allocation21_spill] sm:$0xff]  ;;  %v2844_v13 = vpack.c.bf16 %v2246_v40, %v2238_v36  ;;  %v2263_v10 = vld [vmem:[#allocation5 + $0x348] sm:$0xff] }
 0x1d8   : > { %v2366_v36 = vld [vmem:[#allocation5 + $0x680] sm:$0xff] }
 0x1d9   : > { %v1708_v23 = vcombine.high %v4307_v58, %v4584_v34  ;;  %v2374_v40 = vld [vmem:[#allocation5 + $0x6c0] sm:$0xff] }
 0x1db   : > { %3247 = vrot.lane.b32.xlu0 %v4095_v37, %s3422_s26  ;;  %3232 = vrot.lane.b32.xlu1 %v4580_v11, %s3427_s9  ;;  %v4583_v37 = vld [vmem:[#allocation20_spill] sm:$0xff]  ;;  %v2255_v11 = vld [vmem:[#allocation5 + $0x308] sm:$0xff] }
 0x1df   : > { %3257 = vrot.lane.b32.xlu0 %v4581_v52, %s3426_s8  ;;  %3242 = vrot.lane.b32.xlu1 %v4582_v7, %s3427_s9  ;;  %v2846_v52 = vpack.c.bf16 %v2263_v10, %v2255_v11  ;;  %v2254_v7 = vld [vmem:[#allocation5 + $0x300] sm:$0xff]  ;;  %v2876_v10 = vpack.c.bf16 %v2374_v40, %v2366_v36 }
 0x1e3   : > { %3267 = vrot.lane.b32.xlu0 %v4583_v37, %s3423_s18  ;;  %3252 = vrot.lane.b32.xlu1 %v4180_v54, %s3422_s26  ;;  %v1709_v54 = vcombine.high %v4190_v2, %v4584_v34  ;;  %v1097_v2 = vcombine.high %v4215_v5, %v4584_v34  ;;  %v2182_v5 = vld [vmem:[#allocation5 + $0xc0] sm:$0xff]  ;;  %v2848_v37 = vpack.c.bf16 %v2262_v51, %v2254_v7  ;;  %v2391_v7 = vld [vmem:[#allocation5 + $0x748] sm:$0xff] }
 0x1e4   : > { %v2828_v35 = vpack.c.bf16 %v2182_v5, %v2174_v6  ;;  %v2319_v6 = vld [vmem:[#allocation5 + $0x508] sm:$0xff] }
 0x1e5   : > { %v2327_v5 = vld [vmem:[#allocation5 + $0x548] sm:$0xff] }
 0x1e7   : > { %1865 = vrot.lane.b32.xlu0 %v1708_v23, %s3424_s6  ;;  %3262 = vrot.lane.b32.xlu1 %v4182_v33, %s3426_s8  ;;  %v2159_v33 = vld [vmem:[#allocation5 + $0x8] sm:$0xff] }
 0x1e8   : > { %v2822_v47 = vpack.c.bf16 %v2167_v42, %v2159_v33  ;;  %v2279_v23 = vld [vmem:[#allocation5 + $0x3c8] sm:$0xff] }
 0x1e9   : > { %v2287_v33 = vld [vmem:[#allocation5 + $0x408] sm:$0xff] }
 0x1ea   : > { %2823 = vmatprep.subr.bf16.mxu1 %v2822_v47  ;;  %v2295_v42 = vld [vmem:[#allocation5 + $0x448] sm:$0xff] }
 0x1eb   : > { %1725 = vrot.lane.b32.xlu0 %v1096_v38, %s3424_s6  ;;  %3272 = vrot.lane.b32.xlu1 %v4187_v49, %s3423_s18  ;;  %v1711_v49 = vcombine.high %v4212_v61, %v4584_v34  ;;  %v2271_v34 = vld [vmem:[#allocation5 + $0x388] sm:$0xff] }
 0x1ec   : > { %2825 = vmatpush1.bf16.msra.mxu1 %v2824_v24  ;;  %v2850_v38 = vpack.c.bf16 %v2279_v23, %v2271_v34  ;;  %v2858_v24 = vpack.c.bf16 %v2311_v53, %v2303_v41  ;;  %v2390_v34 = vld [vmem:[#allocation5 + $0x740] sm:$0xff] }
 0x1ef   : > { %1905 = vrot.lane.b32.xlu0 %v1709_v54, %s3425_s7  ;;  %3277 = vrot.lane.b32.xlu1 %v4585_v45, %s3427_s9  ;;  %v2270_v54 = vld [vmem:[#allocation5 + $0x380] sm:$0xff] }
 0x1f0   : > { %v2278_v45 = vld [vmem:[#allocation5 + $0x3c0] sm:$0xff] }
 0x1f3   : > { %1945 = vrot.lane.b32.xlu0 %v1710_v26, %s3426_s8  ;;  %3282 = vrot.lane.b32.xlu1 %v4192_v55, %s3427_s9  ;;  %v2183_v55 = vld [vmem:[#allocation5 + $0xc8] sm:$0xff]  ;;  %v2852_v26 = vpack.c.bf16 %v2278_v45, %v2270_v54 }
 0x1f4   : > { %v2826_v61 = vpack.c.bf16 %v2183_v55, %v2175_v20  ;;  %v2302_v20 = vld [vmem:[#allocation5 + $0x480] sm:$0xff]  ;;  %v2399_v45 = vld [vmem:[#allocation5 + $0x788] sm:$0xff] }
 0x1f5   : > { %v2310_v55 = vld [vmem:[#allocation5 + $0x4c0] sm:$0xff] }
 0x1f6   : > { %2827 = vmatprep.subr.bf16.mxu1 %v2826_v61  ;;  %v2860_v61 = vpack.c.bf16 %v2310_v55, %v2302_v20 }
 0x1f7   : > { %1985 = vrot.lane.b32.xlu0 %v1711_v49, %s3427_s9  ;;  %1765 = vrot.lane.b32.xlu1 %v1097_v2, %s3425_s7  ;;  %v2854_v49 = vpack.c.bf16 %v2295_v42, %v2287_v33  ;;  %v2286_v2 = vld [vmem:[#allocation5 + $0x400] sm:$0xff] }
 0x1f8   : > { %2829 = vmatpush1.bf16.msra.mxu1 %v2828_v35  ;;  %v2856_v47 = vpack.c.bf16 %v2294_v44, %v2286_v2  ;;  %v2318_v35 = vld [vmem:[#allocation5 + $0x500] sm:$0xff] }
 0x1f9   : > { %2831 = vmatprep.subr.bf16.mxu1 %v2830_v1  ;;  %v2864_v1 = vpack.c.bf16 %v2326_v31, %v2318_v35 }
 0x1fb   : > { %1805 = vrot.lane.b32.xlu1 %v1098_v3, %s3426_s8  ;;  %2073 = vperm.xlu0 %3286, %v2070_v43   ;;  %v2862_v3 = vpack.c.bf16 %v2327_v5, %v2319_v6 }
 0x1fc   : > { %2833 = vmatpush1.bf16.msra.mxu1 %v2832_v48  ;;  %v2334_v48 = vld [vmem:[#allocation5 + $0x580] sm:$0xff] }
 0x1fd   : > { %2835 = vmatprep.subr.bf16.mxu1 %v2834_v63  ;;  %v2868_v62 = vpack.c.bf16 %v2342_v57, %v2334_v48 }
 0x1ff   : > { %1845 = vrot.lane.b32.xlu1 %v1099_v32, %s3427_s9  ;;  %v2866_v32 = vpack.c.bf16 %v2343_v59, %v2335_v18 }
 0x200   : > { %2837 = vmatpush1.bf16.msra.mxu1 %v2836_v12  ;;  %v2359_v12 = vld [vmem:[#allocation5 + $0x648] sm:$0xff] }
 0x201   : > { %2839 = vmatprep.subr.bf16.mxu1 %v2838_v56  ;;  %v2870_v39 = vpack.c.bf16 %v2359_v12, %v2351_v9  ;;  %v2358_v56 = vld [vmem:[#allocation5 + $0x640] sm:$0xff]  ;;  %v4587_v9 = vld [vmem:[#allocation11_spill] sm:$0xff] }
 0x204   : > { %2841 = vmatpush1.bf16.msra.mxu1 %v2840_v28  ;;  %v2872_v28 = vpack.c.bf16 %v2358_v56, %v2350_v15  ;;  %v4589_v15 = vld [vmem:[#allocation9_spill] sm:$0xff]  ;;  %v4590_v56 = vld [vmem:[#allocation10_spill] sm:$0xff] }
 0x205   : > { %2843 = vmatprep.subr.bf16.mxu1 %v2842_v4  ;;  %v2874_v4 = vpack.c.bf16 %v2375_v16, %v2367_v22 }
 0x208   : > { %2845 = vmatpush1.bf16.msra.mxu1 %v2844_v13 }
 0x209   : > { %2847 = vmatprep.subr.bf16.mxu1 %v2846_v52  ;;  %v2383_v52 = vld [vmem:[#allocation5 + $0x708] sm:$0xff] }
 0x20a   : > { %v2878_v51 = vpack.c.bf16 %v2391_v7, %v2383_v52 }
 0x20c   : > { %2849 = vmatpush1.bf16.msra.mxu1 %v2848_v37  ;;  %v2382_v37 = vld [vmem:[#allocation5 + $0x700] sm:$0xff] }
 0x20d   : > { %2851 = vmatprep.subr.bf16.mxu1 %v2850_v38  ;;  %v2880_v54 = vpack.c.bf16 %v2390_v34, %v2382_v37  ;;  %v4592_v37 = vld [vmem:[#allocation17_spill] sm:$0xff]  ;;  %v4593_v34 = vld [vmem:[#allocation16_spill] sm:$0xff] }
 0x210   : > { %2853 = vmatpush1.bf16.msra.mxu1 %v2852_v26  ;;  %v2407_v26 = vld [vmem:[#allocation5 + $0x7c8] sm:$0xff] }
 0x211   : > { %2855 = vmatprep.subr.bf16.mxu1 %v2854_v49  ;;  %v2882_v33 = vpack.c.bf16 %v2407_v26, %v2399_v45  ;;  %v4596_v45 = vld [vmem:[#allocation14_spill] sm:$0xff] }
 0x214   : > { %2857 = vmatpush1.bf16.msra.mxu1 %v2856_v47 }
 0x215   : > { %2859 = vmatprep.subr.bf16.mxu1 %v2858_v24 }
 0x218   : > { %2861 = vmatpush1.bf16.msra.mxu1 %v2860_v61 }
 0x219   : > { %v4351_v43 = vpop.permute.xlu0 %1885  ;;  %2863 = vmatprep.subr.bf16.mxu1 %v2862_v3 }
 0x21c   : > { %2865 = vmatpush1.bf16.msra.mxu1 %v2864_v1 }
 0x21d   : > { %v4353_v50 = vpop.permute.xlu0 %1925  ;;  %2867 = vmatprep.subr.bf16.mxu1 %v2866_v32 }
 0x220   : > { %2869 = vmatpush1.bf16.msra.mxu1 %v2868_v62  ;;  %v4586_v62 = vld [vmem:[#allocation13_spill] sm:$0xff] }
 0x221   : > { %v4355_v27 = vpop.permute.xlu1 %1745  ;;  %v4357_v63 = vpop.permute.xlu0 %1965  ;;  %2871 = vmatprep.subr.bf16.mxu1 %v2870_v39  ;;  %v4588_v12 = vcombine.low %v4586_v62, %v4587_v9 }
 0x224   : > { %2873 = vmatpush1.bf16.msra.mxu1 %v2872_v28 }
 0x225   : > { %v4359_v21 = vpop.permute.xlu1 %1785  ;;  %v3148_v8 = vpop.permute.xlu0 %3147  ;;  %2875 = vmatprep.subr.bf16.mxu1 %v2874_v4 }
 0x226   : > { %v3150_v61 = vunpack.i.h.bf16 %v3148_v8  ;;  %v3149_v6 = vunpack.i.l.bf16 %v3148_v8  ;;  %v4591_v8 = vcombine.low %v4589_v15, %v4590_v56 }
 0x228   : > { %2877 = vmatpush1.bf16.msra.mxu1 %v2876_v10  ;;  %v2035_v39 = vsel %vm1992_vm3, %v4588_v12, %v3150_v61  ;;  %v2034_v28 = vsel %vm1992_vm3, %v4591_v8, %v3149_v6 }
 0x229   : > { %v4361_v13 = vpop.permute.xlu1 %1825  ;;  %v3158_v11 = vpop.permute.xlu0 %3157  ;;  %2879 = vmatprep.subr.bf16.mxu1 %v2878_v51 }
 0x22a   : > { %v3160_v5 = vunpack.i.h.bf16 %v3158_v11  ;;  %v3159_v3 = vunpack.i.l.bf16 %v3158_v11 }
 0x22c   : > { %2881 = vmatpush1.bf16.msra.mxu1 %v2880_v54  ;;  %v2039_v4 = vsel %vm1998_vm4, %v2034_v28, %v3159_v3  ;;  %v2040_v36 = vsel %vm1998_vm4, %v2035_v39, %v3160_v5  ;;  %v4595_v54 = vld [vmem:[#allocation12_spill] sm:$0xff] }
 0x22d   : > { %v3168_v23 = vpop.permute.xlu0 %3167  ;;  %v3153_v38 = vpop.permute.xlu1 %3152  ;;  %2883 = vmatprep.subr.bf16.mxu1 %v2882_v33  ;;  %v4597_v26 = vcombine.low %v4595_v54, %v4596_v45 }
 0x22e   : > { %v3170_v1 = vunpack.i.h.bf16 %v3168_v23  ;;  %v3169_v18 = vunpack.i.l.bf16 %v3168_v23  ;;  %v3155_v59 = vunpack.i.h.bf16 %v3153_v38  ;;  %v3154_v32 = vunpack.i.l.bf16 %v3153_v38 }
 0x22f   : > { %v4594_v23 = vcombine.low %v4592_v37, %v4593_v34 }
 0x230   : > { %v2044_v7 = vsel %vm2004_vm5, %v2039_v4, %v3169_v18  ;;  %v2045_v51 = vsel %vm2004_vm5, %v2040_v36, %v3170_v1  ;;  %v1993_v33 = vsel %vm1992_vm3, %v4597_v26, %v3154_v32 }
 0x231   : > { %v3178_v42 = vpop.permute.xlu0 %3177  ;;  %v3163_v49 = vpop.permute.xlu1 %3162  ;;  %v1994_v38 = vsel %vm1992_vm3, %v4594_v23, %v3155_v59 }
 0x232   : > { %v3180_v48 = vunpack.i.h.bf16 %v3178_v42  ;;  %v3179_v57 = vunpack.i.l.bf16 %v3178_v42  ;;  %v3165_v22 = vunpack.i.h.bf16 %v3163_v49  ;;  %v3164_v16 = vunpack.i.l.bf16 %v3163_v49 }
 0x234   : > { %v2049_v42 = vsel %vm2010_vm6, %v2044_v7, %v3179_v57  ;;  %v2050_v49 = vsel %vm2010_vm6, %v2045_v51, %v3180_v48  ;;  %v1999_v6 = vsel %vm1998_vm4, %v1993_v33, %v3164_v16  ;;  %v2000_v5 = vsel %vm1998_vm4, %v1994_v38, %v3165_v22 }
 0x235   : > { %v4363_v2 = vpop.permute.xlu0 %3187  ;;  %v4365_v44 = vpop.permute.xlu1 %3172 }
 0x236   : > { %v3175_v3 = vunpack.i.h.bf16 %v4365_v44  ;;  %v3174_v1 = vunpack.i.l.bf16 %v4365_v44 }
 0x238   : > { %v2006_v28 = vsel %vm2004_vm5, %v2000_v5, %v3175_v3 }
 0x239   : > { %v4367_v47 = vpop.permute.xlu0 %3197  ;;  %v4369_v41 = vpop.permute.xlu1 %3182 }
 0x23a   : > { %v3185_v18 = vunpack.i.h.bf16 %v4369_v41  ;;  %v3184_v59 = vunpack.i.l.bf16 %v4369_v41  ;;  %v2005_v41 = vsel %vm2004_vm5, %v1999_v6, %v3174_v1 }
 0x23c   : > { %v2011_v4 = vsel %vm2010_vm6, %v2005_v41, %v3184_v59 }
 0x23d   : > { %v4371_v53 = vpop.permute.xlu0 %3207  ;;  %v3193_v24 = vpop.permute.xlu1 %3192 }
 0x23e   : > { %v3195_v40 = vunpack.i.h.bf16 %v3193_v24  ;;  %v3194_v11 = vunpack.i.l.bf16 %v3193_v24  ;;  %v3209_v6 = vunpack.i.l.bf16 %v4371_v53  ;;  %v3210_v5 = vunpack.i.h.bf16 %v4371_v53 }
 0x240   : > { %v2054_v57 = vsel %vm2016_vm7, %v2049_v42, %v3194_v11  ;;  %v2055_v48 = vsel %vm2016_vm7, %v2050_v49, %v3195_v40  ;;  %v3190_v42 = vunpack.i.h.bf16 %v4363_v2  ;;  %v3189_v49 = vunpack.i.l.bf16 %v4363_v2 }
 0x241   : > { %v4373_v20 = vpop.permute.xlu0 %3217  ;;  %v4375_v55 = vpop.permute.xlu1 %3202 }
 0x242   : > { %v3204_v9 = vunpack.i.l.bf16 %v4375_v55  ;;  %v3220_v3 = vunpack.i.h.bf16 %v4373_v20  ;;  %v3219_v1 = vunpack.i.l.bf16 %v4373_v20 }
 0x245   : > { %v4377_v35 = vpop.permute.xlu0 %3227  ;;  %v3213_v31 = vpop.permute.xlu1 %3212 }
 0x246   : > { %v3215_v24 = vunpack.i.h.bf16 %v3213_v31  ;;  %v3214_v61 = vunpack.i.l.bf16 %v3213_v31  ;;  %v3205_v31 = vunpack.i.h.bf16 %v4375_v55  ;;  %v2012_v55 = vsel %vm2010_vm6, %v2006_v28, %v3185_v18 }
 0x248   : > { %v2059_v44 = vsel %vm2022_vm8, %v2054_v57, %v3214_v61  ;;  %v2060_v8 = vsel %vm2022_vm8, %v2055_v48, %v3215_v24  ;;  %v2018_v7 = vsel %vm2016_vm7, %v2012_v55, %v3205_v31  ;;  %v3200_v24 = vunpack.i.h.bf16 %v4367_v47 }
 0x249   : > { %v4389_v10 = vpop.permute.xlu0 %3237  ;;  %v3223_v52 = vpop.permute.xlu1 %3222  ;;  %v3199_v61 = vunpack.i.l.bf16 %v4367_v47  ;;  %v3230_v57 = vunpack.i.h.bf16 %v4377_v35  ;;  %v3229_v48 = vunpack.i.l.bf16 %v4377_v35  ;;  %v4599_v47 = vcombine.low %v4048_v19, %v4054_v17 }
 0x24a   : > { %v3225_v15 = vunpack.i.h.bf16 %v3223_v52  ;;  %v3224_v56 = vunpack.i.l.bf16 %v3223_v52  ;;  %v2017_v52 = vsel %vm2016_vm7, %v2011_v4, %v3204_v9  ;;  %v4600_v31 = vcombine.low %v4162_v46, %v4165_v30 }
 0x24b   : > { %v2036_v53 = vsel %vm1992_vm3, %v4599_v47, %v3189_v49  ;;  %v3240_v9 = vunpack.i.h.bf16 %v4389_v10 }
 0x24c   : > { %v2023_v34 = vsel %vm2022_vm8, %v2017_v52, %v3224_v56  ;;  %v2024_v23 = vsel %vm2022_vm8, %v2018_v7, %v3225_v15  ;;  %v1996_v20 = vsel %vm1992_vm3, %v4600_v31, %v3200_v24  ;;  %v2041_v35 = vsel %vm1998_vm4, %v2036_v53, %v3209_v6 }
 0x24d   : > { %v4409_v62 = vpop.permute.xlu0 %3247  ;;  %v3233_v32 = vpop.permute.xlu1 %3232  ;;  %v2002_v30 = vsel %vm1998_vm4, %v1996_v20, %v3220_v3 }
 0x24e   : > { %v3235_v12 = vunpack.i.h.bf16 %v3233_v32  ;;  %v3234_v39 = vunpack.i.l.bf16 %v3233_v32  ;;  %v4598_v32 = vcombine.low %v4087_v60, %v4082_v0  ;;  %v3239_v0 = vunpack.i.l.bf16 %v4389_v10 }
 0x24f   : > { %v4601_v60 = vcombine.low %v4136_v25, %v4139_v29  ;;  %v3250_v19 = vunpack.i.h.bf16 %v4409_v62  ;;  %v3249_v17 = vunpack.i.l.bf16 %v4409_v62  ;;  %v2046_v25 = vsel %vm2004_vm5, %v2041_v35, %v3229_v48 }
 0x250   : > { %v2064_v22 = vsel %vm2028_vm9, %v2059_v44, %v3234_v39  ;;  %v2065_v16 = vsel %vm2028_vm9, %v2060_v8, %v3235_v12  ;;  %v2037_v2 = vsel %vm1992_vm3, %v4598_v32, %v3190_v42  ;;  %v2008_v41 = vsel %vm2004_vm5, %v2002_v30, %v3240_v9  ;;  %v2177_v30 = vld [vmem:[#allocation5 + $0x98] sm:$0xff] }
 0x251   : > { %v4423_v36 = vpop.permute.xlu0 %3257  ;;  %v3243_v40 = vpop.permute.xlu1 %3242  ;;  %v2814_v11 = vpack.c.bf16 %v2065_v16, %v2064_v22  ;;  %v1995_v12 = vsel %vm1992_vm3, %v4601_v60, %v3199_v61  ;;  %v2042_v39 = vsel %vm1998_vm4, %v2037_v2, %v3210_v5  ;;  %v2051_v16 = vsel %vm2010_vm6, %v2046_v25, %v3249_v17  ;;  %v2161_v17 = vld [vmem:[#allocation5 + $0x18] sm:$0xff] }
 0x252   : > { %v3245_v51 = vunpack.i.h.bf16 %v3243_v40  ;;  %v3244_v37 = vunpack.i.l.bf16 %v3243_v40  ;;  %v2001_v46 = vsel %vm1998_vm4, %v1995_v12, %v3219_v1  ;;  %v3259_v15 = vunpack.i.l.bf16 %v4423_v36 }
 0x253   : > { %2815 = vmatprep.subr.bf16.mxu0 %v2814_v11  ;;  %v2047_v29 = vsel %vm2004_vm5, %v2042_v39, %v3230_v57  ;;  %v3260_v44 = vunpack.i.h.bf16 %v4423_v36  ;;  %v2007_v62 = vsel %vm2004_vm5, %v2001_v46, %v3239_v0  ;;  %v2160_v46 = vld [vmem:[#allocation5 + $0x10] sm:$0xff] }
 0x254   : > { %v2029_v38 = vsel %vm2028_vm9, %v2023_v34, %v3244_v37  ;;  %v2030_v54 = vsel %vm2028_vm9, %v2024_v23, %v3245_v51  ;;  %v2052_v4 = vsel %vm2010_vm6, %v2047_v29, %v3250_v19  ;;  %v2056_v11 = vsel %vm2016_vm7, %v2051_v16, %v3259_v15  ;;  %v2185_v15 = vld [vmem:[#allocation5 + $0xd8] sm:$0xff]  ;;  %v2069_v29 = vld [vmem:[%s4539_s1] sm:$0x7] }
 0x255   : > { %v3268_v45 = vpop.permute.xlu0 %3267  ;;  %v3253_v26 = vpop.permute.xlu1 %3252  ;;  %v2816_v33 = vpack.c.bf16 %v2030_v54, %v2029_v38  ;;  %v2057_v37 = vsel %vm2016_vm7, %v2052_v4, %v3260_v44  ;;  %v2192_v4 = vld [vmem:[#allocation5 + $0x110] sm:$0xff] }
 0x256   : > { %v3270_v28 = vunpack.i.h.bf16 %v3268_v45  ;;  %v3269_v22 = vunpack.i.l.bf16 %v3268_v45  ;;  %v3255_v55 = vunpack.i.h.bf16 %v3253_v26  ;;  %v3254_v40 = vunpack.i.l.bf16 %v3253_v26 }
 0x257   : > { %2817 = vmatpush1.bf16.msra.mxu0 %v2816_v33 }
 0x258   : > { %v2061_v54 = vsel %vm2022_vm8, %v2056_v11, %v3269_v22  ;;  %v2062_v45 = vsel %vm2022_vm8, %v2057_v37, %v3270_v28  ;;  %v2014_v42 = vsel %vm2010_vm6, %v2008_v41, %v3255_v55  ;;  %v2013_v49 = vsel %vm2010_vm6, %v2007_v62, %v3254_v40  ;;  %v2176_v62 = vld [vmem:[#allocation5 + $0x90] sm:$0xff]  ;;  %v2193_v28 = vld [vmem:[#allocation5 + $0x118] sm:$0xff] }
 0x259   : > { %v1866_v18 = vpop.permute.xlu0 %1865  ;;  %v3263_v59 = vpop.permute.xlu1 %3262  ;;  %v2184_v41 = vld [vmem:[#allocation5 + $0xd0] sm:$0xff]  ;;  %v2201_v22 = vld [vmem:[#allocation5 + $0x158] sm:$0xff] }
 0x25a   : > { %v2038_v8 = vsel %vm1992_vm3, %v4307_v58, %v1866_v18  ;;  %v3265_v52 = vunpack.i.h.bf16 %v3263_v59  ;;  %v3264_v7 = vunpack.i.l.bf16 %v3263_v59  ;;  %v2894_v16 = vpack.c.bf16 %v2201_v22, %v2193_v28  ;;  %v2200_v55 = vld [vmem:[#allocation5 + $0x150] sm:$0xff]  ;;  %v2209_v40 = vld [vmem:[#allocation5 + $0x198] sm:$0xff] }
 0x25b   : > { %v2043_v36 = vsel %vm1998_vm4, %v2038_v8, %v4351_v43  ;;  %v2890_v8 = vpack.c.bf16 %v2185_v15, %v2177_v30  ;;  %v2217_v11 = vld [vmem:[#allocation5 + $0x1d8] sm:$0xff]  ;;  %v2328_v30 = vld [vmem:[#allocation5 + $0x550] sm:$0xff] }
 0x25c   : > { %v2019_v61 = vsel %vm2016_vm7, %v2013_v49, %v3264_v7  ;;  %v2020_v6 = vsel %vm2016_vm7, %v2014_v42, %v3265_v52  ;;  %v2896_v52 = vpack.c.bf16 %v2200_v55, %v2192_v4  ;;  %v2898_v7 = vpack.c.bf16 %v2217_v11, %v2209_v40  ;;  %v2233_v37 = vld [vmem:[#allocation5 + $0x258] sm:$0xff]  ;;  %v2240_v49 = vld [vmem:[#allocation5 + $0x290] sm:$0xff] }
 0x25d   : > { %v1726_v10 = vpop.permute.xlu0 %1725  ;;  %v3273_v56 = vpop.permute.xlu1 %3272  ;;  %v2337_v15 = vld [vmem:[#allocation5 + $0x598] sm:$0xff]  ;;  %v2352_v28 = vld [vmem:[#allocation5 + $0x610] sm:$0xff] }
 0x25e   : > { %v3275_v26 = vunpack.i.h.bf16 %v3273_v56  ;;  %v3274_v33 = vunpack.i.l.bf16 %v3273_v56  ;;  %v1997_v59 = vsel %vm1992_vm3, %v4316_v14, %v1726_v10  ;;  %v2360_v22 = vld [vmem:[#allocation5 + $0x650] sm:$0xff] }
 0x25f   : > { %v2003_v14 = vsel %vm1998_vm4, %v1997_v59, %v4355_v27  ;;  %v2168_v27 = vld [vmem:[#allocation5 + $0x50] sm:$0xff]  ;;  %v2281_v59 = vld [vmem:[#allocation5 + $0x3d8] sm:$0xff]  ;;  %v2936_v4 = vpack.c.bf16 %v2360_v22, %v2352_v28  ;;  %v2219_v28 = vld [vmem:[#allocation5 + $0x1e8] sm:$0xff] }
 0x260   : > { %v2025_v48 = vsel %vm2022_vm8, %v2019_v61, %v3274_v33  ;;  %v2026_v47 = vsel %vm2022_vm8, %v2020_v6, %v3275_v26  ;;  %v2249_v26 = vld [vmem:[#allocation5 + $0x2d8] sm:$0xff]  ;;  %v2368_v40 = vld [vmem:[#allocation5 + $0x690] sm:$0xff] }
 0x261   : > { %v1906_v58 = vpop.permute.xlu0 %1905  ;;  %v3278_v51 = vpop.permute.xlu1 %3277  ;;  %v2265_v61 = vld [vmem:[#allocation5 + $0x358] sm:$0xff]  ;;  %v2376_v11 = vld [vmem:[#allocation5 + $0x6d0] sm:$0xff] }
 0x262   : > { %v2048_v34 = vsel %vm2004_vm5, %v2043_v36, %v1906_v58  ;;  %v3280_v23 = vunpack.i.h.bf16 %v3278_v51  ;;  %v3279_v38 = vunpack.i.l.bf16 %v3278_v51  ;;  %v2208_v36 = vld [vmem:[#allocation5 + $0x190] sm:$0xff]  ;;  %v2225_v51 = vld [vmem:[#allocation5 + $0x218] sm:$0xff] }
 0x263   : > { %v2053_v5 = vsel %vm2010_vm6, %v2048_v34, %v4353_v50  ;;  %v2216_v58 = vld [vmem:[#allocation5 + $0x1d0] sm:$0xff]  ;;  %v2213_v22 = vld [vmem:[#allocation5 + $0x1b8] sm:$0xff] }
 0x264   : > { %v2066_v43 = vsel %vm2028_vm9, %v2061_v54, %v3279_v38  ;;  %v2067_v24 = vsel %vm2028_vm9, %v2062_v45, %v3280_v23  ;;  %v2900_v34 = vpack.c.bf16 %v2216_v58, %v2208_v36  ;;  %v2902_v23 = vpack.c.bf16 %v2233_v37, %v2225_v51  ;;  %v2224_v38 = vld [vmem:[#allocation5 + $0x210] sm:$0xff]  ;;  %v2241_v45 = vld [vmem:[#allocation5 + $0x298] sm:$0xff] }
 0x265   : > { %v1946_v3 = vpop.permute.xlu0 %1945  ;;  %v3283_v1 = vpop.permute.xlu1 %3282  ;;  %v2818_v18 = vpack.c.bf16 %v2067_v24, %v2066_v43  ;;  %v2232_v54 = vld [vmem:[#allocation5 + $0x250] sm:$0xff]  ;;  %v2906_v42 = vpack.c.bf16 %v2249_v26, %v2241_v45  ;;  %v2257_v24 = vld [vmem:[#allocation5 + $0x318] sm:$0xff]  ;;  %v2940_v36 = vpack.c.bf16 %v2376_v11, %v2368_v40  ;;  %v2398_v45 = vld [vmem:[#allocation5 + $0x780] sm:$0xff] }
 0x266   : > { %v2058_v32 = vsel %vm2016_vm7, %v2053_v5, %v1946_v3  ;;  %v3285_v2 = vunpack.i.h.bf16 %v3283_v1  ;;  %v3284_v57 = vunpack.i.l.bf16 %v3283_v1  ;;  %v2904_v33 = vpack.c.bf16 %v2232_v54, %v2224_v38  ;;  %v2248_v43 = vld [vmem:[#allocation5 + $0x2d0] sm:$0xff]  ;;  %v2409_v38 = vld [vmem:[#allocation5 + $0x7d8] sm:$0xff]  ;;  %v2406_v26 = vld [vmem:[#allocation5 + $0x7c0] sm:$0xff] }
 0x267   : > { %2819 = vmatprep.subr.bf16.mxu0 %v2818_v18  ;;  %v2063_v50 = vsel %vm2022_vm8, %v2058_v32, %v4357_v63  ;;  %v2169_v63 = vld [vmem:[#allocation5 + $0x58] sm:$0xff]  ;;  %v2908_v6 = vpack.c.bf16 %v2248_v43, %v2240_v49  ;;  %v2910_v5 = vpack.c.bf16 %v2265_v61, %v2257_v24  ;;  %v2256_v3 = vld [vmem:[#allocation5 + $0x310] sm:$0xff]  ;;  %v2163_v24 = vld [vmem:[#allocation5 + $0x28] sm:$0xff] }
 0x268   : > { %v2031_v53 = vsel %vm2028_vm9, %v2025_v48, %v3284_v57  ;;  %v2032_v31 = vsel %vm2028_vm9, %v2026_v47, %v3285_v2  ;;  %v2886_v10 = vpack.c.bf16 %v2169_v63, %v2161_v17  ;;  %v2264_v1 = vld [vmem:[#allocation5 + $0x350] sm:$0xff]  ;;  %v2273_v18 = vld [vmem:[#allocation5 + $0x398] sm:$0xff]  ;;  %v2171_v61 = vld [vmem:[#allocation5 + $0x68] sm:$0xff] }
 0x269   : > { %v1986_v20 = vpop.permute.xlu0 %1985  ;;  %v1766_v9 = vpop.permute.xlu1 %1765  ;;  %v2820_v0 = vpack.c.bf16 %v2032_v31, %v2031_v53  ;;  %v2912_v32 = vpack.c.bf16 %v2264_v1, %v2256_v3  ;;  %v2914_v2 = vpack.c.bf16 %v2281_v59, %v2273_v18  ;;  %v2272_v57 = vld [vmem:[#allocation5 + $0x390] sm:$0xff]  ;;  %v2289_v47 = vld [vmem:[#allocation5 + $0x418] sm:$0xff]  ;;  %v2162_v18 = vld [vmem:[#allocation5 + $0x20] sm:$0xff] }
 0x26a   : > { %v2068_v60 = vsel %vm2028_vm9, %v2063_v50, %v1986_v20  ;;  %v2009_v12 = vsel %vm2004_vm5, %v2003_v14, %v1766_v9  ;;  %v2280_v48 = vld [vmem:[#allocation5 + $0x3d0] sm:$0xff]  ;;  %v2297_v53 = vld [vmem:[#allocation5 + $0x458] sm:$0xff]  ;;  %v2218_v40 = vld [vmem:[#allocation5 + $0x1e0] sm:$0xff] }
 0x26b   : > { %2821 = vmatpush1.bf16.msra.mxu0 %v2820_v0  ;;  %v2015_v35 = vsel %vm2010_vm6, %v2009_v12, %v4359_v21  ;;  %v2888_v21 = vpack.c.bf16 %v2168_v27, %v2160_v46  ;;  %v2916_v31 = vpack.c.bf16 %v2280_v48, %v2272_v57  ;;  %v2918_v50 = vpack.c.bf16 %v2297_v53, %v2289_v47  ;;  %v2288_v20 = vld [vmem:[#allocation5 + $0x410] sm:$0xff]  ;;  %v2305_v9 = vld [vmem:[#allocation5 + $0x498] sm:$0xff]  ;;  %v2179_v47 = vld [vmem:[#allocation5 + $0xa8] sm:$0xff] }
 0x26c   : > { %2807 = vmatprep.subr.msk.mxu0 %vm2080_vm10, %v2068_v60  ;;  %v2296_v14 = vld [vmem:[#allocation5 + $0x450] sm:$0xff]  ;;  %v2313_v0 = vld [vmem:[#allocation5 + $0x4d8] sm:$0xff] }
 0x26d   : > { %v1806_v19 = vpop.permute.xlu1 %1805  ;;  %v2920_v60 = vpack.c.bf16 %v2296_v14, %v2288_v20  ;;  %v2922_v12 = vpack.c.bf16 %v2313_v0, %v2305_v9  ;;  %v2321_v17 = vld [vmem:[#allocation5 + $0x518] sm:$0xff]  ;;  %v2320_v27 = vld [vmem:[#allocation5 + $0x510] sm:$0xff] }
 0x26e   : > { %v2021_v39 = vsel %vm2016_vm7, %v2015_v35, %v1806_v19  ;;  %v2304_v35 = vld [vmem:[#allocation5 + $0x490] sm:$0xff]  ;;  %v2329_v63 = vld [vmem:[#allocation5 + $0x558] sm:$0xff] }
 0x26f   : > { %v2027_v56 = vsel %vm2022_vm8, %v2021_v39, %v4361_v13  ;;  %v2892_v13 = vpack.c.bf16 %v2184_v41, %v2176_v62  ;;  %v2312_v19 = vld [vmem:[#allocation5 + $0x4d0] sm:$0xff]  ;;  %v2926_v46 = vpack.c.bf16 %v2329_v63, %v2321_v17  ;;  %v2173_v3 = vld [vmem:[#allocation5 + $0x78] sm:$0xff]  ;;  %v2195_v63 = vld [vmem:[#allocation5 + $0x128] sm:$0xff] }
 0x270   : > { %v2924_v39 = vpack.c.bf16 %v2312_v19, %v2304_v35  ;;  %v2384_v51 = vld [vmem:[#allocation5 + $0x710] sm:$0xff]  ;;  %v2189_v20 = vld [vmem:[#allocation5 + $0xf8] sm:$0xff] }
 0x271   : > { %v1846_v25 = vpop.permute.xlu1 %1845  ;;  %v2392_v37 = vld [vmem:[#allocation5 + $0x750] sm:$0xff] }
 0x272   : > { %v2033_v44 = vsel %vm2028_vm9, %v2027_v56, %v1846_v25  ;;  %v2928_v56 = vpack.c.bf16 %v2328_v30, %v2320_v27  ;;  %v2408_v49 = vld [vmem:[#allocation5 + $0x7d0] sm:$0xff]  ;;  %v2203_v27 = vld [vmem:[#allocation5 + $0x168] sm:$0xff]  ;;  %v2197_v30 = vld [vmem:[#allocation5 + $0x138] sm:$0xff] }
 0x273   : > { %2808 = vmatpush1.msk.msra.mxu0 %vm2080_vm10, %v2033_v44  ;;  %v2353_v44 = vld [vmem:[#allocation5 + $0x618] sm:$0xff]  ;;  %v2172_v57 = vld [vmem:[#allocation5 + $0x70] sm:$0xff] }
 0x274   : > { %2809 = vmatmul.mubr.msk.f32.vlgmr.msra.gmra.mrb[0].mxu0 %vm2076_vm11, %v2069_v29  ;;  %2887 = vmatprep.subr.bf16.mxu0 %v2886_v10  ;;  %v2345_v10 = vld [vmem:[#allocation5 + $0x5d8] sm:$0xff]  ;;  %v2336_v29 = vld [vmem:[#allocation5 + $0x590] sm:$0xff] }
 0x275   : > { %2889 = vmatpush1.bf16.msra.mxu0 %v2888_v21  ;;  %v2930_v25 = vpack.c.bf16 %v2345_v10, %v2337_v15  ;;  %v2344_v21 = vld [vmem:[#allocation5 + $0x5d0] sm:$0xff]  ;;  %v2205_v15 = vld [vmem:[#allocation5 + $0x178] sm:$0xff] }
 0x276   : > { %2891 = vmatprep.subr.bf16.mxu0 %v2890_v8  ;;  %v2361_v8 = vld [vmem:[#allocation5 + $0x658] sm:$0xff]  ;;  %v2932_v62 = vpack.c.bf16 %v2344_v21, %v2336_v29  ;;  %v2180_v19 = vld [vmem:[#allocation5 + $0xb0] sm:$0xff]  ;;  %v2202_v29 = vld [vmem:[#allocation5 + $0x160] sm:$0xff]  ;;  %v2958_v21 = vpack.c.bf16 %v2203_v27, %v2195_v63 }
 0x277   : > { %v2934_v41 = vpack.c.bf16 %v2361_v8, %v2353_v44  ;;  %v2188_v17 = vld [vmem:[#allocation5 + $0xf0] sm:$0xff]  ;;  %v3022_v44 = vpack.c.bf16 %v2205_v15, %v2197_v30  ;;  %v2283_v63 = vld [vmem:[#allocation5 + $0x3e8] sm:$0xff]  ;;  %v2274_v15 = vld [vmem:[#allocation5 + $0x3a0] sm:$0xff] }
 0x278   : > { %v2196_v8 = vld [vmem:[#allocation5 + $0x130] sm:$0xff] }
 0x279   : > { %2893 = vmatpush1.bf16.msra.mxu0 %v2892_v13  ;;  %v2369_v13 = vld [vmem:[#allocation5 + $0x698] sm:$0xff] }
 0x27a   : > { %2895 = vmatprep.subr.bf16.mxu0 %v2894_v16  ;;  %v2377_v16 = vld [vmem:[#allocation5 + $0x6d8] sm:$0xff]  ;;  %v2074_v59 = vpop.permute.xlu0 %2073 }
 0x27b   : > { %v2938_v55 = vpack.c.bf16 %v2377_v16, %v2369_v13  ;;  %v2221_v13 = vld [vmem:[#allocation5 + $0x1f8] sm:$0xff] }
 0x27d   : > { %2897 = vmatpush1.bf16.msra.mxu0 %v2896_v52  ;;  %v2385_v52 = vld [vmem:[#allocation5 + $0x718] sm:$0xff] }
 0x27e   : > { %2899 = vmatprep.subr.bf16.mxu0 %v2898_v7  ;;  %v2393_v7 = vld [vmem:[#allocation5 + $0x758] sm:$0xff] }
 0x27f   : > { %v2942_v58 = vpack.c.bf16 %v2393_v7, %v2385_v52  ;;  %v3026_v52 = vpack.c.bf16 %v2221_v13, %v2213_v22  ;;  %v2212_v7 = vld [vmem:[#allocation5 + $0x1b0] sm:$0xff]  ;;  %v2290_v13 = vld [vmem:[#allocation5 + $0x420] sm:$0xff] }
 0x281   : > { %2901 = vmatpush1.bf16.msra.mxu0 %v2900_v34  ;;  %v2944_v34 = vpack.c.bf16 %v2392_v37, %v2384_v51  ;;  %v2235_v51 = vld [vmem:[#allocation5 + $0x268] sm:$0xff]  ;;  %v2229_v37 = vld [vmem:[#allocation5 + $0x238] sm:$0xff] }
 0x282   : > { %2903 = vmatprep.subr.bf16.mxu0 %v2902_v23  ;;  %v2401_v23 = vld [vmem:[#allocation5 + $0x798] sm:$0xff] }
 0x283   : > { %v2946_v54 = vpack.c.bf16 %v2409_v38, %v2401_v23 }
 0x285   : > { %2905 = vmatpush1.bf16.msra.mxu0 %v2904_v33  ;;  %v2400_v33 = vld [vmem:[#allocation5 + $0x790] sm:$0xff] }
 0x286   : > { %2907 = vmatprep.subr.bf16.mxu0 %v2906_v42  ;;  %v2884_v42 = vpack.c.bf16 %v2406_v26, %v2398_v45  ;;  %v2948_v43 = vpack.c.bf16 %v2408_v49, %v2400_v33  ;;  %v2234_v45 = vld [vmem:[#allocation5 + $0x260] sm:$0xff]  ;;  %v2236_v49 = vld [vmem:[#allocation5 + $0x270] sm:$0xff] }
 0x288   : > { %2885 = vmatpush1.bf16.msra.mxu1 %v2884_v42  ;;  %v2228_v42 = vld [vmem:[#allocation5 + $0x230] sm:$0xff] }
 0x289   : > { %2909 = vmatpush1.bf16.msra.mxu0 %v2908_v6  ;;  %v2165_v6 = vld [vmem:[#allocation5 + $0x38] sm:$0xff] }
 0x28a   : > { %2911 = vmatprep.subr.bf16.mxu0 %v2910_v5  ;;  %v2950_v5 = vpack.c.bf16 %v2171_v61, %v2163_v24  ;;  %v3014_v1 = vpack.c.bf16 %v2173_v3, %v2165_v6  ;;  %v2251_v24 = vld [vmem:[#allocation5 + $0x2e8] sm:$0xff]  ;;  %v2245_v61 = vld [vmem:[#allocation5 + $0x2b8] sm:$0xff]  ;;  %v3032_v3 = vpack.c.bf16 %v2236_v49, %v2228_v42 }
 0x28b   : > { %v2253_v6 = vld [vmem:[#allocation5 + $0x2f8] sm:$0xff]  ;;  %v2331_v42 = vld [vmem:[#allocation5 + $0x568] sm:$0xff] }
 0x28c   : > { %2951 = vmatprep.subr.bf16.mxu1 %v2950_v5  ;;  %v2325_v49 = vld [vmem:[#allocation5 + $0x538] sm:$0xff] }
 0x28d   : > { %2913 = vmatpush1.bf16.msra.mxu0 %v2912_v32  ;;  %v2170_v32 = vld [vmem:[#allocation5 + $0x60] sm:$0xff] }
 0x28e   : > { %2915 = vmatprep.subr.bf16.mxu0 %v2914_v2  ;;  %v2164_v2 = vld [vmem:[#allocation5 + $0x30] sm:$0xff]  ;;  %v2952_v9 = vpack.c.bf16 %v2170_v32, %v2162_v18  ;;  %v2250_v18 = vld [vmem:[#allocation5 + $0x2e0] sm:$0xff]  ;;  %v3034_v32 = vpack.c.bf16 %v2253_v6, %v2245_v61 }
 0x28f   : > { %v3016_v0 = vpack.c.bf16 %v2172_v57, %v2164_v2  ;;  %v2244_v2 = vld [vmem:[#allocation5 + $0x2b0] sm:$0xff]  ;;  %v2322_v6 = vld [vmem:[#allocation5 + $0x520] sm:$0xff] }
 0x290   : > { %v2252_v57 = vld [vmem:[#allocation5 + $0x2f0] sm:$0xff] }
 0x291   : > { %2917 = vmatpush1.bf16.msra.mxu0 %v2916_v31  ;;  %v2187_v31 = vld [vmem:[#allocation5 + $0xe8] sm:$0xff] }
 0x292   : > { %2919 = vmatprep.subr.bf16.mxu0 %v2918_v50  ;;  %v2181_v50 = vld [vmem:[#allocation5 + $0xb8] sm:$0xff] }
 0x295   : > { %2921 = vmatpush1.bf16.msra.mxu0 %v2920_v60  ;;  %v2178_v60 = vld [vmem:[#allocation5 + $0xa0] sm:$0xff] }
 0x296   : > { %2923 = vmatprep.subr.bf16.mxu0 %v2922_v12  ;;  %v2186_v12 = vld [vmem:[#allocation5 + $0xe0] sm:$0xff] }
 0x297   : > { %v2956_v10 = vpack.c.bf16 %v2186_v12, %v2178_v60  ;;  %v2260_v12 = vld [vmem:[#allocation5 + $0x330] sm:$0xff] }
 0x299   : > { %2925 = vmatpush1.bf16.msra.mxu0 %v2924_v39  ;;  %v2954_v39 = vpack.c.bf16 %v2187_v31, %v2179_v47  ;;  %v2267_v47 = vld [vmem:[#allocation5 + $0x368] sm:$0xff]  ;;  %v2269_v31 = vld [vmem:[#allocation5 + $0x378] sm:$0xff] }
 0x29a   : > { %2927 = vmatprep.subr.bf16.mxu0 %v2926_v46  ;;  %v3018_v46 = vpack.c.bf16 %v2189_v20, %v2181_v50  ;;  %v3036_v20 = vpack.c.bf16 %v2252_v57, %v2244_v2  ;;  %v2347_v2 = vld [vmem:[#allocation5 + $0x5e8] sm:$0xff]  ;;  %v2341_v57 = vld [vmem:[#allocation5 + $0x5b8] sm:$0xff] }
 0x29d   : > { %2929 = vmatpush1.bf16.msra.mxu0 %v2928_v56  ;;  %v3020_v56 = vpack.c.bf16 %v2188_v17, %v2180_v19  ;;  %v2268_v19 = vld [vmem:[#allocation5 + $0x370] sm:$0xff]  ;;  %v2275_v17 = vld [vmem:[#allocation5 + $0x3a8] sm:$0xff] }
 0x29e   : > { %2931 = vmatprep.subr.bf16.mxu0 %v2930_v25  ;;  %v2194_v25 = vld [vmem:[#allocation5 + $0x120] sm:$0xff]  ;;  %v3040_v30 = vpack.c.bf16 %v2268_v19, %v2260_v12  ;;  %v2363_v12 = vld [vmem:[#allocation5 + $0x668] sm:$0xff]  ;;  %v2357_v19 = vld [vmem:[#allocation5 + $0x638] sm:$0xff] }
 0x29f   : > { %v2960_v16 = vpack.c.bf16 %v2202_v29, %v2194_v25  ;;  %v2276_v29 = vld [vmem:[#allocation5 + $0x3b0] sm:$0xff] }
 0x2a1   : > { %2933 = vmatpush1.bf16.msra.mxu0 %v2932_v62  ;;  %v2204_v62 = vld [vmem:[#allocation5 + $0x170] sm:$0xff] }
 0x2a2   : > { %2935 = vmatprep.subr.bf16.mxu0 %v2934_v41  ;;  %v2211_v41 = vld [vmem:[#allocation5 + $0x1a8] sm:$0xff] }
 0x2a3   : > { %v2962_v11 = vpack.c.bf16 %v2219_v28, %v2211_v41  ;;  %v2301_v41 = vld [vmem:[#allocation5 + $0x478] sm:$0xff] }
 0x2a5   : > { %2937 = vmatpush1.bf16.msra.mxu0 %v2936_v4  ;;  %v3024_v4 = vpack.c.bf16 %v2204_v62, %v2196_v8  ;;  %v2299_v8 = vld [vmem:[#allocation5 + $0x468] sm:$0xff]  ;;  %v2293_v62 = vld [vmem:[#allocation5 + $0x438] sm:$0xff] }
 0x2a6   : > { %2939 = vmatprep.subr.bf16.mxu0 %v2938_v55  ;;  %v2210_v55 = vld [vmem:[#allocation5 + $0x1a0] sm:$0xff] }
 0x2a7   : > { %v2964_v23 = vpack.c.bf16 %v2218_v40, %v2210_v55  ;;  %v3046_v55 = vpack.c.bf16 %v2301_v41, %v2293_v62  ;;  %v2292_v40 = vld [vmem:[#allocation5 + $0x430] sm:$0xff]  ;;  %v2370_v41 = vld [vmem:[#allocation5 + $0x6a0] sm:$0xff] }
 0x2a9   : > { %2941 = vmatpush1.bf16.msra.mxu0 %v2940_v36  ;;  %v2220_v36 = vld [vmem:[#allocation5 + $0x1f0] sm:$0xff] }
 0x2aa   : > { %2943 = vmatprep.subr.bf16.mxu0 %v2942_v58  ;;  %v2227_v58 = vld [vmem:[#allocation5 + $0x228] sm:$0xff]  ;;  %v3028_v38 = vpack.c.bf16 %v2220_v36, %v2212_v7  ;;  %v2309_v36 = vld [vmem:[#allocation5 + $0x4b8] sm:$0xff] }
 0x2ab   : > { %v2966_v26 = vpack.c.bf16 %v2235_v51, %v2227_v58  ;;  %v2315_v7 = vld [vmem:[#allocation5 + $0x4e8] sm:$0xff]  ;;  %v2317_v58 = vld [vmem:[#allocation5 + $0x4f8] sm:$0xff] }
 0x2ad   : > { %2945 = vmatpush1.bf16.msra.mxu0 %v2944_v34  ;;  %v2237_v34 = vld [vmem:[#allocation5 + $0x278] sm:$0xff] }
 0x2ae   : > { %2947 = vmatprep.subr.bf16.mxu0 %v2946_v54  ;;  %v2226_v54 = vld [vmem:[#allocation5 + $0x220] sm:$0xff]  ;;  %v3030_v33 = vpack.c.bf16 %v2237_v34, %v2229_v37 }
 0x2af   : > { %v2968_v5 = vpack.c.bf16 %v2234_v45, %v2226_v54  ;;  %v2306_v34 = vld [vmem:[#allocation5 + $0x4a0] sm:$0xff]  ;;  %v3050_v54 = vpack.c.bf16 %v2317_v58, %v2309_v36  ;;  %v2308_v45 = vld [vmem:[#allocation5 + $0x4b0] sm:$0xff] }
 0x2b0   : > { %v2386_v58 = vld [vmem:[#allocation5 + $0x720] sm:$0xff] }
 0x2b1   : > { %2949 = vmatpush1.bf16.msra.mxu0 %v2948_v43  ;;  %v2243_v43 = vld [vmem:[#allocation5 + $0x2a8] sm:$0xff] }
 0x2b2   : > { %3015 = vmatprep.subr.bf16.mxu0 %v3014_v1  ;;  %v2242_v1 = vld [vmem:[#allocation5 + $0x2a0] sm:$0xff] }
 0x2b3   : > { %v2972_v50 = vpack.c.bf16 %v2250_v18, %v2242_v1  ;;  %v2324_v18 = vld [vmem:[#allocation5 + $0x530] sm:$0xff] }
 0x347   : > { %v2153_v48 = vpop.f32.mrb[0].mxu0 }
 0x348   : > { %v2155_v53 = vpop.f32.mrb[1].mxu0  ;;  %v4514_v35 = vadd.f32 %v2153_v48, %v2074_v59  ;;  %v2259_v48 = vld [vmem:[#allocation5 + $0x328] sm:$0xff] }
 0x349   : > { %v2156_v14 = vadd.f32 %v2155_v53, %v2074_v59  ;;  %v2970_v59 = vpack.c.bf16 %v2251_v24, %v2243_v43  ;;  %v2261_v53 = vld [vmem:[#allocation5 + $0x338] sm:$0xff] }
 0x34a   : > { %v3038_v60 = vpack.c.bf16 %v2269_v31, %v2261_v53  ;;  %v2333_v43 = vld [vmem:[#allocation5 + $0x578] sm:$0xff]  ;;  %v2338_v31 = vld [vmem:[#allocation5 + $0x5a0] sm:$0xff] }
 0x34b   : > { %2478 = vmatprep.mubr.f32.mxu1 %v2156_v14  ;;  %2549 = vmatprep.mubr.f32.mxu0 %v2156_v14  ;;  %v3054_v1 = vpack.c.bf16 %v2333_v43, %v2325_v49  ;;  %v2402_v43 = vld [vmem:[#allocation5 + $0x7a0] sm:$0xff] }
 0x34c   : > { %2479 = vmatmul.mubr.f32.vlgmr.msra.gmra.mrb[0].mxu1 %v4514_v35  ;;  %2550 = vmatmul.mubr.f32.vlgmr.msra.gmra.mrb[2].mxu0 %v4514_v35 }
 0x34d   : > { %2953 = vmatpush1.bf16.msra.mxu1 %v2952_v9  ;;  %3017 = vmatpush1.bf16.msra.mxu0 %v3016_v0  ;;  %v2266_v9 = vld [vmem:[#allocation5 + $0x360] sm:$0xff]  ;;  %v2974_v0 = vpack.c.bf16 %v2267_v47, %v2259_v48  ;;  %v2349_v48 = vld [vmem:[#allocation5 + $0x5f8] sm:$0xff] }
 0x34e   : > { %2620 = vmatprep.mubr.f32.mxu1 %v2156_v14  ;;  %2691 = vmatprep.mubr.f32.mxu0 %v2156_v14  ;;  %v2258_v14 = vld [vmem:[#allocation5 + $0x320] sm:$0xff] }
 0x34f   : > { %2955 = vmatprep.subr.bf16.mxu1 %v2954_v39  ;;  %3019 = vmatprep.subr.bf16.mxu0 %v3018_v46  ;;  %v2277_v39 = vld [vmem:[#allocation5 + $0x3b8] sm:$0xff]  ;;  %v2976_v27 = vpack.c.bf16 %v2266_v9, %v2258_v14  ;;  %v3058_v14 = vpack.c.bf16 %v2349_v48, %v2341_v57  ;;  %v2340_v9 = vld [vmem:[#allocation5 + $0x5b0] sm:$0xff] }
 0x350   : > { %v2285_v46 = vld [vmem:[#allocation5 + $0x3f8] sm:$0xff] }
 0x351   : > { %2957 = vmatpush1.bf16.msra.mxu1 %v2956_v10  ;;  %3021 = vmatpush1.bf16.msra.mxu0 %v3020_v56  ;;  %v2282_v10 = vld [vmem:[#allocation5 + $0x3e0] sm:$0xff]  ;;  %v2978_v56 = vpack.c.bf16 %v2283_v63, %v2275_v17  ;;  %v3042_v25 = vpack.c.bf16 %v2285_v46, %v2277_v39  ;;  %v2365_v17 = vld [vmem:[#allocation5 + $0x678] sm:$0xff] }
 0x352   : > { %2959 = vmatprep.subr.bf16.mxu1 %v2958_v21  ;;  %3023 = vmatprep.subr.bf16.mxu0 %v3022_v44  ;;  %v2284_v21 = vld [vmem:[#allocation5 + $0x3f0] sm:$0xff]  ;;  %v2291_v44 = vld [vmem:[#allocation5 + $0x428] sm:$0xff]  ;;  %v2980_v28 = vpack.c.bf16 %v2282_v10, %v2274_v15  ;;  %v2354_v46 = vld [vmem:[#allocation5 + $0x620] sm:$0xff]  ;;  %v3062_v15 = vpack.c.bf16 %v2365_v17, %v2357_v19 }
 0x353   : > { %v3044_v22 = vpack.c.bf16 %v2284_v21, %v2276_v29  ;;  %v2356_v10 = vld [vmem:[#allocation5 + $0x630] sm:$0xff]  ;;  %v2379_v29 = vld [vmem:[#allocation5 + $0x6e8] sm:$0xff]  ;;  %v2373_v21 = vld [vmem:[#allocation5 + $0x6b8] sm:$0xff] }
 0x355   : > { %2961 = vmatpush1.bf16.msra.mxu1 %v2960_v16  ;;  %3025 = vmatpush1.bf16.msra.mxu0 %v3024_v4  ;;  %v2298_v16 = vld [vmem:[#allocation5 + $0x460] sm:$0xff]  ;;  %v2982_v4 = vpack.c.bf16 %v2299_v8, %v2291_v44  ;;  %v2381_v44 = vld [vmem:[#allocation5 + $0x6f8] sm:$0xff] }
 0x356   : > { %2963 = vmatprep.subr.bf16.mxu1 %v2962_v11  ;;  %3027 = vmatprep.subr.bf16.mxu0 %v3026_v52  ;;  %v2300_v11 = vld [vmem:[#allocation5 + $0x470] sm:$0xff]  ;;  %v2307_v52 = vld [vmem:[#allocation5 + $0x4a8] sm:$0xff]  ;;  %v2984_v51 = vpack.c.bf16 %v2298_v16, %v2290_v13  ;;  %v3066_v13 = vpack.c.bf16 %v2381_v44, %v2373_v21 }
 0x357   : > { %v3048_v37 = vpack.c.bf16 %v2300_v11, %v2292_v40  ;;  %v2372_v16 = vld [vmem:[#allocation5 + $0x6b0] sm:$0xff]  ;;  %v2395_v40 = vld [vmem:[#allocation5 + $0x768] sm:$0xff]  ;;  %v2389_v11 = vld [vmem:[#allocation5 + $0x738] sm:$0xff] }
 0x359   : > { %2965 = vmatpush1.bf16.msra.mxu1 %v2964_v23  ;;  %3029 = vmatpush1.bf16.msra.mxu0 %v3028_v38  ;;  %v2314_v23 = vld [vmem:[#allocation5 + $0x4e0] sm:$0xff]  ;;  %v2986_v38 = vpack.c.bf16 %v2315_v7, %v2307_v52  ;;  %v2397_v52 = vld [vmem:[#allocation5 + $0x778] sm:$0xff] }
 0x35a   : > { %2967 = vmatprep.subr.bf16.mxu1 %v2966_v26  ;;  %3031 = vmatprep.subr.bf16.mxu0 %v3030_v33  ;;  %v2316_v26 = vld [vmem:[#allocation5 + $0x4f0] sm:$0xff]  ;;  %v2323_v33 = vld [vmem:[#allocation5 + $0x528] sm:$0xff]  ;;  %v2988_v24 = vpack.c.bf16 %v2314_v23, %v2306_v34  ;;  %v3070_v34 = vpack.c.bf16 %v2397_v52, %v2389_v11 }
 0x35b   : > { %v3052_v61 = vpack.c.bf16 %v2316_v26, %v2308_v45  ;;  %v2388_v23 = vld [vmem:[#allocation5 + $0x730] sm:$0xff]  ;;  %v2411_v45 = vld [vmem:[#allocation5 + $0x7e8] sm:$0xff]  ;;  %v2405_v26 = vld [vmem:[#allocation5 + $0x7b8] sm:$0xff] }
 0x35d   : > { %2969 = vmatpush1.bf16.msra.mxu1 %v2968_v5  ;;  %3033 = vmatpush1.bf16.msra.mxu0 %v3032_v3  ;;  %v2330_v5 = vld [vmem:[#allocation5 + $0x560] sm:$0xff]  ;;  %v2990_v3 = vpack.c.bf16 %v2331_v42, %v2323_v33  ;;  %v2413_v33 = vld [vmem:[#allocation5 + $0x7f8] sm:$0xff] }
 0x35e   : > { %2971 = vmatprep.subr.bf16.mxu1 %v2970_v59  ;;  %3035 = vmatprep.subr.bf16.mxu0 %v3034_v32  ;;  %v2332_v59 = vld [vmem:[#allocation5 + $0x570] sm:$0xff]  ;;  %v2339_v32 = vld [vmem:[#allocation5 + $0x5a8] sm:$0xff]  ;;  %v2992_v47 = vpack.c.bf16 %v2330_v5, %v2322_v6  ;;  %v2410_v6 = vld [vmem:[#allocation5 + $0x7e0] sm:$0xff] }
 0x35f   : > { %v3056_v53 = vpack.c.bf16 %v2332_v59, %v2324_v18  ;;  %v2404_v5 = vld [vmem:[#allocation5 + $0x7b0] sm:$0xff] }
 0x361   : > { %2973 = vmatpush1.bf16.msra.mxu1 %v2972_v50  ;;  %3037 = vmatpush1.bf16.msra.mxu0 %v3036_v20  ;;  %v2346_v50 = vld [vmem:[#allocation5 + $0x5e0] sm:$0xff]  ;;  %v2994_v20 = vpack.c.bf16 %v2347_v2, %v2339_v32 }
 0x362   : > { %2975 = vmatprep.subr.bf16.mxu1 %v2974_v0  ;;  %3039 = vmatprep.subr.bf16.mxu0 %v3038_v60  ;;  %v2348_v0 = vld [vmem:[#allocation5 + $0x5f0] sm:$0xff]  ;;  %v2355_v60 = vld [vmem:[#allocation5 + $0x628] sm:$0xff]  ;;  %v2996_v63 = vpack.c.bf16 %v2346_v50, %v2338_v31 }
 0x363   : > { %v3060_v39 = vpack.c.bf16 %v2348_v0, %v2340_v9 }
 0x365   : > { %2977 = vmatpush1.bf16.msra.mxu1 %v2976_v27  ;;  %3041 = vmatpush1.bf16.msra.mxu0 %v3040_v30  ;;  %v2362_v27 = vld [vmem:[#allocation5 + $0x660] sm:$0xff]  ;;  %v2998_v30 = vpack.c.bf16 %v2363_v12, %v2355_v60 }
 0x366   : > { %2979 = vmatprep.subr.bf16.mxu1 %v2978_v56  ;;  %3043 = vmatprep.subr.bf16.mxu0 %v3042_v25  ;;  %v2364_v56 = vld [vmem:[#allocation5 + $0x670] sm:$0xff]  ;;  %v2371_v25 = vld [vmem:[#allocation5 + $0x6a8] sm:$0xff]  ;;  %v3000_v8 = vpack.c.bf16 %v2362_v27, %v2354_v46 }
 0x367   : > { %v3064_v62 = vpack.c.bf16 %v2364_v56, %v2356_v10 }
 0x369   : > { %2981 = vmatpush1.bf16.msra.mxu1 %v2980_v28  ;;  %3045 = vmatpush1.bf16.msra.mxu0 %v3044_v22  ;;  %v2378_v28 = vld [vmem:[#allocation5 + $0x6e0] sm:$0xff]  ;;  %v3002_v22 = vpack.c.bf16 %v2379_v29, %v2371_v25 }
 0x36a   : > { %2983 = vmatprep.subr.bf16.mxu1 %v2982_v4  ;;  %3047 = vmatprep.subr.bf16.mxu0 %v3046_v55  ;;  %v2380_v4 = vld [vmem:[#allocation5 + $0x6f0] sm:$0xff]  ;;  %v2387_v55 = vld [vmem:[#allocation5 + $0x728] sm:$0xff]  ;;  %v3004_v7 = vpack.c.bf16 %v2378_v28, %v2370_v41 }
 0x36b   : > { %v3068_v36 = vpack.c.bf16 %v2380_v4, %v2372_v16 }
 0x36d   : > { %2985 = vmatpush1.bf16.msra.mxu1 %v2984_v51  ;;  %3049 = vmatpush1.bf16.msra.mxu0 %v3048_v37  ;;  %v2394_v51 = vld [vmem:[#allocation5 + $0x760] sm:$0xff]  ;;  %v3006_v37 = vpack.c.bf16 %v2395_v40, %v2387_v55 }
 0x36e   : > { %2987 = vmatprep.subr.bf16.mxu1 %v2986_v38  ;;  %3051 = vmatprep.subr.bf16.mxu0 %v3050_v54  ;;  %v2396_v38 = vld [vmem:[#allocation5 + $0x770] sm:$0xff]  ;;  %v2403_v54 = vld [vmem:[#allocation5 + $0x7a8] sm:$0xff]  ;;  %v3008_v42 = vpack.c.bf16 %v2394_v51, %v2386_v58 }
 0x36f   : > { %v3072_v49 = vpack.c.bf16 %v2396_v38, %v2388_v23 }
 0x371   : > { %2989 = vmatpush1.bf16.msra.mxu1 %v2988_v24  ;;  %3053 = vmatpush1.bf16.msra.mxu0 %v3052_v61  ;;  %v3010_v24 = vpack.c.bf16 %v2411_v45, %v2403_v54  ;;  %v3074_v61 = vpack.c.bf16 %v2413_v33, %v2405_v26 }
 0x372   : > { %2991 = vmatprep.subr.bf16.mxu1 %v2990_v3  ;;  %3055 = vmatprep.subr.bf16.mxu0 %v3054_v1  ;;  %v2412_v3 = vld [vmem:[#allocation5 + $0x7f0] sm:$0xff]  ;;  %v3012_v1 = vpack.c.bf16 %v2410_v6, %v2402_v43 }
 0x373   : > { %v3076_v18 = vpack.c.bf16 %v2412_v3, %v2404_v5 }
 0x375   : > { %2993 = vmatpush1.bf16.msra.mxu1 %v2992_v47  ;;  %3057 = vmatpush1.bf16.msra.mxu0 %v3056_v53 }
 0x376   : > { %2995 = vmatprep.subr.bf16.mxu1 %v2994_v20  ;;  %3059 = vmatprep.subr.bf16.mxu0 %v3058_v14 }
 0x379   : > { %2997 = vmatpush1.bf16.msra.mxu1 %v2996_v63  ;;  %3061 = vmatpush1.bf16.msra.mxu0 %v3060_v39 }
 0x37a   : > { %2999 = vmatprep.subr.bf16.mxu1 %v2998_v30  ;;  %3063 = vmatprep.subr.bf16.mxu0 %v3062_v15 }
 0x37d   : > { %3001 = vmatpush1.bf16.msra.mxu1 %v3000_v8  ;;  %3065 = vmatpush1.bf16.msra.mxu0 %v3064_v62 }
 0x37e   : > { %3003 = vmatprep.subr.bf16.mxu1 %v3002_v22  ;;  %3067 = vmatprep.subr.bf16.mxu0 %v3066_v13 }
 0x381   : > { %3005 = vmatpush1.bf16.msra.mxu1 %v3004_v7  ;;  %3069 = vmatpush1.bf16.msra.mxu0 %v3068_v36 }
 0x382   : > { %3007 = vmatprep.subr.bf16.mxu1 %v3006_v37  ;;  %3071 = vmatprep.subr.bf16.mxu0 %v3070_v34 }
 0x385   : > { %3009 = vmatpush1.bf16.msra.mxu1 %v3008_v42  ;;  %3073 = vmatpush1.bf16.msra.mxu0 %v3072_v49 }
 0x386   : > { %3011 = vmatprep.subr.bf16.mxu1 %v3010_v24  ;;  %3075 = vmatprep.subr.bf16.mxu0 %v3074_v61 }
 0x389   : > { %3013 = vmatpush1.bf16.msra.mxu1 %v3012_v1  ;;  %3077 = vmatpush1.bf16.msra.mxu0 %v3076_v18 }
 0x38c   : > { %2621 = vmatmul.mubr.f32.vlgmr.msra.gmra.mrb[2].mxu1 %v4514_v35  ;;  %2692 = vmatmul.mubr.f32.vlgmr.msra.gmra.mrb[4].mxu0 %v4514_v35 }
 0x41f   : > { %v2480_v59 = vpop.f32.mrb[0].mxu1  ;;  %v2551_v32 = vpop.f32.mrb[2].mxu0 }
 0x420   : > { %v2482_v2 = vpop.f32.mrb[1].mxu1  ;;  %v2553_v57 = vpop.f32.mrb[3].mxu0 }
 0x421   : > { %v2706_v48 = vcombine.low %v2480_v59, %v2482_v2  ;;  %v2707_v47 = vcombine.low %v2551_v32, %v2553_v57 }
 0x423   : > { %2714 = vst [vmem:[%s232_s29] sm:$0x77] %v2706_v48  ;;  %2715 = vst [vmem:[%s232_s29 + $0x8] sm:$0x77] %v2707_v47 }
 0x45f   : > { %v2622_v53 = vpop.f32.mrb[2].mxu1  ;;  %v2693_v31 = vpop.f32.mrb[4].mxu0 }
 0x460   : > { %v2624_v50 = vpop.f32.mrb[3].mxu1  ;;  %v2695_v20 = vpop.f32.mrb[5].mxu0 }
 0x461   : > { %v2708_v35 = vcombine.low %v2622_v53, %v2624_v50  ;;  %v2709_v14 = vcombine.low %v2693_v31, %v2695_v20 }
 0x463   : > { %2716 = vst [vmem:[%s232_s29 + $0x10] sm:$0x77] %v2708_v35  ;;  %2717 = vst [vmem:[%s232_s29 + $0x18] sm:$0x77] %v2709_v14 }
 0x464 PF: > { %p15_p8 = scmp.ge.s32.totalorder %s3498_s25, 4   ;;  %s4602_s15 = smov %s3399_s16 }
 0x465   : > { %s4603_s16 = smov %s3403_s17  ;;  %s4604_s17 = smov %s3524_s14 }
 0x466   : > { %s4605_s18 = smov %s3498_s25  ;;  %17 = sbr.rel (!%p15_p8) target bundleno = 4 (0x4), region = 80 }
 0x46d   :  { %2739 = vsyncpa [#allocation4], 1 }
 0x46e   :  { %2741 = vsyncpa [#allocation4 + $0x1], 1 }
 0x46f   :  { %2742 = vsyncpa [#allocation6], 1 }

</bundles_post_ra>
